<compile_context>
chip_gen: v7x
topology: tpu7x:2x2x1
jax: 0.10.0
libtpu: 0.0.40
codegen_flags: <defaults>
</compile_context>

<pallas_src>
import jax
import jax.numpy as jnp
from jax import lax
from jax.experimental import pallas as pl
from jax.experimental.pallas import tpu as pltpu

# synthetic small sizes (real model: in_planes=768, 12 heads, mlp 3072)
D = 32               # self.in_planes
NUM_HEADS = 4
DH = D // NUM_HEADS
SCALE = DH ** -0.5
MLP_H = 4 * D
LN_EPS = 1e-6        # timm ViT LayerNorm eps
BN_EPS = 1e-5        # nn.BatchNorm1d eps
LANE = 128
# Fits every generation's headroom (v7x physical VMEM is 64 MiB).  At real
# D=768 raise to ~100 MiB on v5e/v6e, keep <=56 MiB on v7x.
VMEM_LIMIT_BYTES = 48 * 1024 * 1024

_BLOCK_KEYS = ('ln1_g', 'ln1_b', 'q_w', 'q_b', 'kv_w', 'kv_b',
               'proj_w', 'proj_b', 'ln2_g', 'ln2_b',
               'fc1_w', 'fc1_b', 'fc2_w', 'fc2_b', 'lnf_g', 'lnf_b')


# ---------------------------------------------------------------------------
# in-kernel math helpers (all f32 elementwise; bf16 only at MXU inputs)
# ---------------------------------------------------------------------------
def _layernorm(v, g, b):
    mu = jnp.mean(v, axis=-1, keepdims=True)
    var = jnp.mean((v - mu) ** 2, axis=-1, keepdims=True)
    return (v - mu) * lax.rsqrt(var + LN_EPS) * g + b


def _erf(x):
    # Abramowitz & Stegun 7.1.26 (|err| < 1.5e-7), built only from
    # mul/add/exp/where so it needs no native erf lowering.
    a1, a2, a3, a4, a5 = 0.254829592, -0.284496736, 1.421413741, -1.453152027, 1.061405429
    p = 0.3275911
    sgn = jnp.where(x < 0.0, jnp.float32(-1.0), jnp.float32(1.0))
    ax = jnp.abs(x)
    t = 1.0 / (1.0 + p * ax)
    poly = ((((a5 * t + a4) * t + a3) * t + a2) * t + a1) * t
    return sgn * (1.0 - poly * jnp.exp(-ax * ax))


def _gelu(v):
    # PyTorch nn.GELU default = erf form.
    return 0.5 * v * (1.0 + _erf(v * jnp.float32(0.7071067811865476)))


def _unpack_w(wrefs):
    return {k: r[0] for k, r in zip(_BLOCK_KEYS, wrefs)}


def _encoder_token(xg, w):
    """ViT encoder block + final LayerNorm; returns cls-token features only.

    xg: (TB, N, D) f32, already patch-gated.  Matmul weights in `w` are bf16,
    LN params / biases f32.  K/V are projected for all rows, Q only for the
    cls row.  Attention scores and weighted value sums run on the VPU/XLU
    (M=1 MXU matmuls are pure latency); the output projection is accumulated
    per head so head results never all stay live / never need a lane concat.
    """
    TB, N, _ = xg.shape
    h = _layernorm(xg, w['ln1_g'], w['ln1_b'])                         # f32
    hb = h.astype(jnp.bfloat16)
    kv = jnp.dot(hb.reshape(TB * N, D), w['kv_w'],
                 preferred_element_type=jnp.float32) + w['kv_b']       # (TB*N, 2D)
    kv = kv.reshape(TB, N, 2 * D)
    q = jnp.dot(hb[:, 0, :], w['q_w'],
                preferred_element_type=jnp.float32) + w['q_b']         # (TB, D) cls row only
    k = kv[:, :, :D]
    v = kv[:, :, D:]

    qk = q[:, None, :] * k                                             # (TB, N, D) VPU
    t = xg[:, 0, :] + w['proj_b']                                      # residual + proj bias
    for hd in range(NUM_HEADS):                                        # static unroll
        lo = hd * DH
        sc = jnp.sum(qk[:, :, lo:lo + DH], axis=-1) * SCALE            # (TB, N)
        sc = sc - jnp.max(sc, axis=-1, keepdims=True)
        p = jnp.exp(sc)
        p = p / jnp.sum(p, axis=-1, keepdims=True)                     # exact (parity)
        oh = jnp.sum(p[:, :, None] * v[:, :, lo:lo + DH], axis=1)      # (TB, DH)
        t = t + jnp.dot(oh.astype(jnp.bfloat16), w['proj_w'][lo:lo + DH, :],
                        preferred_element_type=jnp.float32)
    # TODO(synk): drop_path (stochastic depth, rate 0.1) treated as identity.

    h2 = _layernorm(t, w['ln2_g'], w['ln2_b'])
    h2 = jnp.dot(h2.astype(jnp.bfloat16), w['fc1_w'],
                 preferred_element_type=jnp.float32) + w['fc1_b']
    h2 = _gelu(h2)
    t = t + jnp.dot(h2.astype(jnp.bfloat16), w['fc2_w'],
                    preferred_element_type=jnp.float32) + w['fc2_b']
    return _layernorm(t, w['lnf_g'], w['lnf_b'])


# ---------------------------------------------------------------------------
# kernels
# ---------------------------------------------------------------------------
def branches_kernel(gate_ref, x_ref, *refs):
    """Eval kernel.  Grid = (branch, batch_tile).
    branch 0: b1 on raw features, 1: b2 bio-gated, 2: b2 clothes-gated.
    Weight refs carry slab min(branch, 1) of the stacked b1/b2 weights."""
    wrefs = refs[:len(_BLOCK_KEYS)]
    tok_ref = refs[len(_BLOCK_KEYS)]
    w = _unpack_w(wrefs)
    # Zero-gating (not row removal) is exactly what the PyTorch module does:
    # gated-out rows still pass through LN and the attention softmax.
    xg = x_ref[...] * gate_ref[0][:, :, None]
    tok_ref[0] = _encoder_token(xg, w)


def train_kernel(x_ref, *refs):
    """Training kernel.  Grid = (batch_tile,), "arbitrary".
    Runs b1 on raw features (branch 0 only) and fuses the BatchNorm1d
    bottleneck + bias-free classifier into the last-tile epilogue."""
    nw = len(_BLOCK_KEYS)
    wrefs = refs[:nw]
    bng_ref, bnb_ref, clsw_ref = refs[nw:nw + 3]
    tok_ref, cls_ref = refs[nw + 3:nw + 5]
    tok_acc = refs[nw + 5]

    w = _unpack_w(wrefs)
    tok = _encoder_token(x_ref[...], w)                     # (TB, D) f32
    tok_ref[...] = tok
    bt = pl.program_id(0)
    tok_acc[bt] = tok                                       # keep full batch resident

    @pl.when(bt == pl.num_programs(0) - 1)
    def _():
        nbt, tb, _ = tok_acc.shape
        f = tok_acc[...].reshape(nbt * tb, D)               # (B, D)
        # BatchNorm1d, training mode: batch stats, biased variance, affine.
        mu = jnp.mean(f, axis=0, keepdims=True)
        var = jnp.mean((f - mu) ** 2, axis=0, keepdims=True)
        y = (f - mu) * lax.rsqrt(var + BN_EPS) * bng_ref[...] + bnb_ref[...]
        cls_ref[...] = jnp.dot(y.astype(jnp.bfloat16), clsw_ref[...],
                               preferred_element_type=jnp.float32)
    # TODO(synk): BatchNorm1d running-stat (momentum) buffers are not tracked.


# ---------------------------------------------------------------------------
# pallas_call wrappers
# ---------------------------------------------------------------------------
def _batch_tile(b):
    # Full batch if small; otherwise a multiple-of-8 tile so the (TB, N) gate
    # block satisfies the (8,128) constraint and VMEM per step is bounded
    # (sweep the cap at real sizes).
    if b <= 8:
        return b
    for tb in (16, 8):
        if b % tb == 0:
            return tb
    return b


def _weight_specs(weights, index_map):
    # Full (single-slab) weight blocks; their block index changes at most once
    # per call.  (pl.Buffered(1) here is a further v7x VMEM knob.)
    return [pl.BlockSpec((1,) + w.shape[1:], index_map) for w in weights]


def eval_branches_forward(features, gates, block_p):
    """Run b1 (branch 0) and both b2 branches (1: bio, 2: clothes)."""
    B, N, _ = features.shape
    tb = _batch_tile(B)
    nbt = B // tb
    weights = [block_p[k] for k in _BLOCK_KEYS]

    wmap = lambda r, bt: (jnp.minimum(r, 1), 0, 0)     # slab 0 = b1, slab 1 = b2
    in_specs = [pl.BlockSpec((1, tb, N), lambda r, bt: (r, bt, 0)),
                pl.BlockSpec((tb, N, D), lambda r, bt: (bt, 0, 0))]
    in_specs += _weight_specs(weights, wmap)

    return pl.pallas_call(
        branches_kernel,
        out_shape=jax.ShapeDtypeStruct((3, B, D), jnp.float32),
        grid=(3, nbt),
        in_specs=in_specs,
        out_specs=pl.BlockSpec((1, tb, D), lambda r, bt: (r, bt, 0)),
        compiler_params=pltpu.CompilerParams(
            dimension_semantics=("parallel", "parallel"),
            vmem_limit_bytes=VMEM_LIMIT_BYTES),
    )(gates, features, *weights)


def train_forward(features, block_p, bn_g, bn_b, w_cls_pad):
    """b1 token features + fused BN bottleneck + bias-free classifier."""
    B, N, _ = features.shape
    tb = _batch_tile(B)
    nbt = B // tb
    weights = [block_p[k] for k in _BLOCK_KEYS]
    c_pad = w_cls_pad.shape[1]

    wmap = lambda bt: (0, 0, 0)                        # b1 slab only
    in_specs = [pl.BlockSpec((tb, N, D), lambda bt: (bt, 0, 0))]
    in_specs += _weight_specs(weights, wmap)
    in_specs += [pl.BlockSpec((1, D), lambda bt: (0, 0)),
                 pl.BlockSpec((1, D), lambda bt: (0, 0)),
                 pl.BlockSpec((D, c_pad), lambda bt: (0, 0))]

    global_feat, cls_pad = pl.pallas_call(
        train_kernel,
        out_shape=(jax.ShapeDtypeStruct((B, D), jnp.float32),
                   jax.ShapeDtypeStruct((B, c_pad), jnp.float32)),
        grid=(nbt,),
        in_specs=in_specs,
        out_specs=(pl.BlockSpec((tb, D), lambda bt: (bt, 0)),
                   pl.BlockSpec((B, c_pad), lambda bt: (0, 0))),
        scratch_shapes=[pltpu.VMEM((nbt, tb, D), jnp.float32)],
        compiler_params=pltpu.CompilerParams(
            # batch axis is sequential: the fused BN/classifier epilogue
            # accumulates the full batch of token features in scratch.
            dimension_semantics=("arbitrary",),
            vmem_limit_bytes=VMEM_LIMIT_BYTES),
    )(features, *weights, bn_g, bn_b, w_cls_pad)
    return global_feat, cls_pad


# ---------------------------------------------------------------------------
# parameter init (deterministic, synthetic) + forward
# ---------------------------------------------------------------------------
def _round_up(x, m):
    return (x + m - 1) // m * m


def init_params(key, num_classes, num_clothes):
    ks = jax.random.split(key, 8)
    nrm = lambda k, shape, std: jax.random.normal(k, shape, jnp.float32) * std
    ones = lambda s: jnp.ones(s, jnp.float32)
    zeros = lambda s: jnp.zeros(s, jnp.float32)
    bf = lambda a: a.astype(jnp.bfloat16)

    # Fused qkv weight, split so the kernel never computes Q for patch rows.
    qkv_w = nrm(ks[0], (D, 3 * D), 0.02)
    block = {
        'ln1_g': ones((1, D)), 'ln1_b': zeros((1, D)),
        'q_w': bf(qkv_w[:, :D]), 'q_b': zeros((1, D)),
        'kv_w': bf(qkv_w[:, D:]), 'kv_b': zeros((1, 2 * D)),
        'proj_w': bf(nrm(ks[1], (D, D), 0.02)), 'proj_b': zeros((1, D)),
        'ln2_g': ones((1, D)), 'ln2_b': zeros((1, D)),
        'fc1_w': bf(nrm(ks[2], (D, MLP_H), 0.02)), 'fc1_b': zeros((1, MLP_H)),
        'fc2_w': bf(nrm(ks[3], (MLP_H, D), 0.02)), 'fc2_b': zeros((1, D)),
        'lnf_g': ones((1, D)), 'lnf_b': zeros((1, D)),
    }
    # b1 / b2 are deepcopies of the same backbone block+norm -> identical init;
    # stack [b1, b2] on a leading axis so one fused pallas_call serves b1 and
    # both b2 branches (weight BlockSpec selects slab min(branch, 1)).
    p = {'block': {k: jnp.stack([v, v], axis=0) for k, v in block.items()}}
    # classifiers: weights_init_classifier -> normal(std=0.001), bias-free.
    # The ID classifier is stored transposed, bf16, lane-padded to 128 so the
    # fused kernel's logit store is an unmasked full-width vst.
    c_pad = _round_up(num_classes, LANE)
    w_cls = nrm(ks[4], (D, num_classes), 0.001)
    p['w_cls'] = bf(jnp.pad(w_cls, ((0, 0), (0, c_pad - num_classes))))
    p['w_clothes'] = nrm(ks[5], (D, num_clothes), 0.001)   # feeds external loss only
    p['w_bio'] = nrm(ks[6], (D, num_classes), 0.001)       # feeds external loss only
    # bottlenecks: weights_init_kaiming(BatchNorm) -> weight=1, bias=0
    for name in ('bn', 'bn_clothes', 'bn_bio'):
        p[name + '_g'] = ones((1, D))
        p[name + '_b'] = zeros((1, D))
    p['feat_weight'] = [1.0, 1.0, 1.0]   # original default [1.0, 1.0] indexes [2] (bug)
    return p


def tcip_forward(features, patch_sem, params, num_classes, training=True):
    # TODO(synk): self.base (vit_mask ViT backbone) is an external module; its
    # outputs `features` (B, 1+P, D) and `patch_sem` (B, P, 2) are inputs here.
    B, N, _ = features.shape

    if training:
        global_feat, cls_pad = train_forward(features, params['block'],
                                             params['bn_g'], params['bn_b'],
                                             params['w_cls'])
        cls_score = cls_pad[:, :num_classes]
        # TODO(synk): clothes/bio branches + their BN/classifiers feed only the
        # external CrossEntropy/Triplet losses stored on self.loss (not
        # returned); they are skipped here (equivalent to jit DCE).
        return cls_score, global_feat

    # eval: per-branch 0/1 gate masks (cls row always kept); the kernel does
    # x * gate, faithful to the module's zero-multiplied patches.
    one = jnp.ones((B, 1), jnp.float32)
    g_bio = jnp.concatenate([one, (patch_sem[:, :, 0] > 0).astype(jnp.float32)], axis=1)
    g_clo = jnp.concatenate([one, (patch_sem[:, :, 1] > 0).astype(jnp.float32)], axis=1)
    gates = jnp.stack([jnp.ones((B, N), jnp.float32), g_bio, g_clo], axis=0)  # (3, B, N)
    # use_mask=False (module default) -> no mask_token substitution.

    toks = eval_branches_forward(features, gates, params['block'])
    global_feat, lf_bio_token, lf_clothes_token = toks[0], toks[1], toks[2]
    fw = params['feat_weight']                      # use_local_feat=True
    feat = jnp.concatenate([fw[0] * global_feat,
                            fw[1] * lf_bio_token,
                            fw[2] * lf_clothes_token], axis=1)
    # normal_scale=-1 (default) -> no L2 renormalization; get_hm=False.
    return feat


if __name__ == "__main__":
    B, P = 2, 7                      # N = 1 + P = 8 (sublane-aligned sequence)
    num_classes, num_clothes = 5, 3
    key = jax.random.PRNGKey(0)
    k1, k2, k3 = jax.random.split(key, 3)
    features = jax.random.normal(k1, (B, 1 + P, D), jnp.float32)   # backbone token output
    patch_sem = jax.random.normal(k2, (B, P, 2), jnp.float32)      # backbone semantic scores
    params = init_params(k3, num_classes, num_clothes)

    fwd = jax.jit(tcip_forward, static_argnames=('num_classes', 'training'))
    cls_score, global_feat = fwd(features, patch_sem, params,
                                 num_classes=num_classes, training=True)
    feat = fwd(features, patch_sem, params, num_classes=num_classes, training=False)
    jax.block_until_ready((cls_score, global_feat, feat))

    assert cls_score.shape == (B, num_classes)
    assert global_feat.shape == (B, D)
    assert feat.shape == (B, 3 * D)
    print("KERNEL_OK")
</pallas_src>

<mosaic_0001>
module attributes {stable_mosaic.version = 11 : i64} {
  func.func @train_kernel(%arg0: i32, %arg1: memref<2x8x32xf32, #tpu.memory_space<vmem>>, %arg2: memref<1x1x32xf32, #tpu.memory_space<vmem>>, %arg3: memref<1x1x32xf32, #tpu.memory_space<vmem>>, %arg4: memref<1x32x32xbf16, #tpu.memory_space<vmem>>, %arg5: memref<1x1x32xf32, #tpu.memory_space<vmem>>, %arg6: memref<1x32x64xbf16, #tpu.memory_space<vmem>>, %arg7: memref<1x1x64xf32, #tpu.memory_space<vmem>>, %arg8: memref<1x32x32xbf16, #tpu.memory_space<vmem>>, %arg9: memref<1x1x32xf32, #tpu.memory_space<vmem>>, %arg10: memref<1x1x32xf32, #tpu.memory_space<vmem>>, %arg11: memref<1x1x32xf32, #tpu.memory_space<vmem>>, %arg12: memref<1x32x128xbf16, #tpu.memory_space<vmem>>, %arg13: memref<1x1x128xf32, #tpu.memory_space<vmem>>, %arg14: memref<1x128x32xbf16, #tpu.memory_space<vmem>>, %arg15: memref<1x1x32xf32, #tpu.memory_space<vmem>>, %arg16: memref<1x1x32xf32, #tpu.memory_space<vmem>>, %arg17: memref<1x1x32xf32, #tpu.memory_space<vmem>>, %arg18: memref<1x32xf32, #tpu.memory_space<vmem>>, %arg19: memref<1x32xf32, #tpu.memory_space<vmem>>, %arg20: memref<32x128xbf16, #tpu.memory_space<vmem>>, %arg21: memref<2x32xf32, #tpu.memory_space<vmem>>, %arg22: memref<2x128xf32, #tpu.memory_space<vmem>>, %arg23: memref<1x2x32xf32, #tpu.memory_space<vmem>>) attributes {dimension_semantics = [#tpu.dimension_semantics<arbitrary>], iteration_bounds = array<i64: 1>, scalar_prefetch = 0 : i64, scratch_operands = 1 : i64, tpu.core_type = #tpu.core_type<tc>, window_params = [{transform_indices = @transform_0, window_bounds = array<i64: 2, 8, 32>}, {transform_indices = @transform_1, window_bounds = array<i64: 1, 1, 32>}, {transform_indices = @transform_2, window_bounds = array<i64: 1, 1, 32>}, {transform_indices = @transform_3, window_bounds = array<i64: 1, 32, 32>}, {transform_indices = @transform_4, window_bounds = array<i64: 1, 1, 32>}, {transform_indices = @transform_5, window_bounds = array<i64: 1, 32, 64>}, {transform_indices = @transform_6, window_bounds = array<i64: 1, 1, 64>}, {transform_indices = @transform_7, window_bounds = array<i64: 1, 32, 32>}, {transform_indices = @transform_8, window_bounds = array<i64: 1, 1, 32>}, {transform_indices = @transform_9, window_bounds = array<i64: 1, 1, 32>}, {transform_indices = @transform_10, window_bounds = array<i64: 1, 1, 32>}, {transform_indices = @transform_11, window_bounds = array<i64: 1, 32, 128>}, {transform_indices = @transform_12, window_bounds = array<i64: 1, 1, 128>}, {transform_indices = @transform_13, window_bounds = array<i64: 1, 128, 32>}, {transform_indices = @transform_14, window_bounds = array<i64: 1, 1, 32>}, {transform_indices = @transform_15, window_bounds = array<i64: 1, 1, 32>}, {transform_indices = @transform_16, window_bounds = array<i64: 1, 1, 32>}, {pipeline_mode = #tpu.pipeline_mode<synchronous>, transform_indices = @transform_17, window_bounds = array<i64: 1, 32>}, {pipeline_mode = #tpu.pipeline_mode<synchronous>, transform_indices = @transform_18, window_bounds = array<i64: 1, 32>}, {pipeline_mode = #tpu.pipeline_mode<synchronous>, transform_indices = @transform_19, window_bounds = array<i64: 32, 128>}, {transform_indices = @transform_20, window_bounds = array<i64: 2, 32>}, {pipeline_mode = #tpu.pipeline_mode<synchronous>, transform_indices = @transform_21, window_bounds = array<i64: 2, 128>}]} {
    %c0 = arith.constant 0 : index
    %c0_0 = arith.constant 0 : index
    %c0_1 = arith.constant 0 : index
    %0 = vector.load %arg2[%c0, %c0_0, %c0_1] : memref<1x1x32xf32, #tpu.memory_space<vmem>>, vector<1x1x32xf32>
    %1 = vector.shape_cast %0 : vector<1x1x32xf32> to vector<1x32xf32>
    %c0_2 = arith.constant 0 : index
    %c0_3 = arith.constant 0 : index
    %c0_4 = arith.constant 0 : index
    %2 = vector.load %arg3[%c0_2, %c0_3, %c0_4] : memref<1x1x32xf32, #tpu.memory_space<vmem>>, vector<1x1x32xf32>
    %3 = vector.shape_cast %2 : vector<1x1x32xf32> to vector<1x32xf32>
    %c0_5 = arith.constant 0 : index
    %c0_6 = arith.constant 0 : index
    %c0_7 = arith.constant 0 : index
    %4 = vector.load %arg4[%c0_5, %c0_6, %c0_7] : memref<1x32x32xbf16, #tpu.memory_space<vmem>>, vector<1x32x32xbf16>
    %5 = vector.shape_cast %4 : vector<1x32x32xbf16> to vector<32x32xbf16>
    %c0_8 = arith.constant 0 : index
    %c0_9 = arith.constant 0 : index
    %c0_10 = arith.constant 0 : index
    %6 = vector.load %arg5[%c0_8, %c0_9, %c0_10] : memref<1x1x32xf32, #tpu.memory_space<vmem>>, vector<1x1x32xf32>
    %7 = vector.shape_cast %6 : vector<1x1x32xf32> to vector<1x32xf32>
    %c0_11 = arith.constant 0 : index
    %c0_12 = arith.constant 0 : index
    %c0_13 = arith.constant 0 : index
    %8 = vector.load %arg6[%c0_11, %c0_12, %c0_13] : memref<1x32x64xbf16, #tpu.memory_space<vmem>>, vector<1x32x64xbf16>
    %9 = vector.shape_cast %8 : vector<1x32x64xbf16> to vector<32x64xbf16>
    %c0_14 = arith.constant 0 : index
    %c0_15 = arith.constant 0 : index
    %c0_16 = arith.constant 0 : index
    %10 = vector.load %arg7[%c0_14, %c0_15, %c0_16] : memref<1x1x64xf32, #tpu.memory_space<vmem>>, vector<1x1x64xf32>
    %11 = vector.shape_cast %10 : vector<1x1x64xf32> to vector<1x64xf32>
    %c0_17 = arith.constant 0 : index
    %c0_18 = arith.constant 0 : index
    %c0_19 = arith.constant 0 : index
    %12 = vector.load %arg8[%c0_17, %c0_18, %c0_19] : memref<1x32x32xbf16, #tpu.memory_space<vmem>>, vector<1x32x32xbf16>
    %13 = vector.shape_cast %12 : vector<1x32x32xbf16> to vector<32x32xbf16>
    %c0_20 = arith.constant 0 : index
    %c0_21 = arith.constant 0 : index
    %c0_22 = arith.constant 0 : index
    %14 = vector.load %arg9[%c0_20, %c0_21, %c0_22] : memref<1x1x32xf32, #tpu.memory_space<vmem>>, vector<1x1x32xf32>
    %15 = vector.shape_cast %14 : vector<1x1x32xf32> to vector<1x32xf32>
    %c0_23 = arith.constant 0 : index
    %c0_24 = arith.constant 0 : index
    %c0_25 = arith.constant 0 : index
    %16 = vector.load %arg10[%c0_23, %c0_24, %c0_25] : memref<1x1x32xf32, #tpu.memory_space<vmem>>, vector<1x1x32xf32>
    %17 = vector.shape_cast %16 : vector<1x1x32xf32> to vector<1x32xf32>
    %c0_26 = arith.constant 0 : index
    %c0_27 = arith.constant 0 : index
    %c0_28 = arith.constant 0 : index
    %18 = vector.load %arg11[%c0_26, %c0_27, %c0_28] : memref<1x1x32xf32, #tpu.memory_space<vmem>>, vector<1x1x32xf32>
    %19 = vector.shape_cast %18 : vector<1x1x32xf32> to vector<1x32xf32>
    %c0_29 = arith.constant 0 : index
    %c0_30 = arith.constant 0 : index
    %c0_31 = arith.constant 0 : index
    %20 = vector.load %arg12[%c0_29, %c0_30, %c0_31] : memref<1x32x128xbf16, #tpu.memory_space<vmem>>, vector<1x32x128xbf16>
    %21 = vector.shape_cast %20 : vector<1x32x128xbf16> to vector<32x128xbf16>
    %c0_32 = arith.constant 0 : index
    %c0_33 = arith.constant 0 : index
    %c0_34 = arith.constant 0 : index
    %22 = vector.load %arg13[%c0_32, %c0_33, %c0_34] : memref<1x1x128xf32, #tpu.memory_space<vmem>>, vector<1x1x128xf32>
    %23 = vector.shape_cast %22 : vector<1x1x128xf32> to vector<1x128xf32>
    %c0_35 = arith.constant 0 : index
    %c0_36 = arith.constant 0 : index
    %c0_37 = arith.constant 0 : index
    %24 = vector.load %arg14[%c0_35, %c0_36, %c0_37] : memref<1x128x32xbf16, #tpu.memory_space<vmem>>, vector<1x128x32xbf16>
    %25 = vector.shape_cast %24 : vector<1x128x32xbf16> to vector<128x32xbf16>
    %c0_38 = arith.constant 0 : index
    %c0_39 = arith.constant 0 : index
    %c0_40 = arith.constant 0 : index
    %26 = vector.load %arg15[%c0_38, %c0_39, %c0_40] : memref<1x1x32xf32, #tpu.memory_space<vmem>>, vector<1x1x32xf32>
    %27 = vector.shape_cast %26 : vector<1x1x32xf32> to vector<1x32xf32>
    %c0_41 = arith.constant 0 : index
    %c0_42 = arith.constant 0 : index
    %c0_43 = arith.constant 0 : index
    %28 = vector.load %arg16[%c0_41, %c0_42, %c0_43] : memref<1x1x32xf32, #tpu.memory_space<vmem>>, vector<1x1x32xf32>
    %29 = vector.shape_cast %28 : vector<1x1x32xf32> to vector<1x32xf32>
    %c0_44 = arith.constant 0 : index
    %c0_45 = arith.constant 0 : index
    %c0_46 = arith.constant 0 : index
    %30 = vector.load %arg17[%c0_44, %c0_45, %c0_46] : memref<1x1x32xf32, #tpu.memory_space<vmem>>, vector<1x1x32xf32>
    %31 = vector.shape_cast %30 : vector<1x1x32xf32> to vector<1x32xf32>
    %c0_47 = arith.constant 0 : index
    %c0_48 = arith.constant 0 : index
    %c0_49 = arith.constant 0 : index
    %32 = vector.load %arg1[%c0_47, %c0_48, %c0_49] : memref<2x8x32xf32, #tpu.memory_space<vmem>>, vector<2x8x32xf32>
    %cst = arith.constant dense<0.000000e+00> : vector<2x8xf32>
    %33 = vector.multi_reduction <add>, %32, %cst [2] : vector<2x8x32xf32> to vector<2x8xf32>
    %34 = vector.shape_cast %33 : vector<2x8xf32> to vector<2x8x1xf32>
    %cst_50 = arith.constant 3.200000e+01 : f32
    %35 = vector.broadcast %cst_50 : f32 to vector<2x8x1xf32>
    %36 = arith.divf %34, %35 : vector<2x8x1xf32>
    %37 = vector.broadcast %36 : vector<2x8x1xf32> to vector<2x8x32xf32>
    %38 = arith.subf %32, %37 : vector<2x8x32xf32>
    %39 = arith.mulf %38, %38 : vector<2x8x32xf32>
    %cst_51 = arith.constant dense<0.000000e+00> : vector<2x8xf32>
    %40 = vector.multi_reduction <add>, %39, %cst_51 [2] : vector<2x8x32xf32> to vector<2x8xf32>
    %41 = vector.shape_cast %40 : vector<2x8xf32> to vector<2x8x1xf32>
    %cst_52 = arith.constant 3.200000e+01 : f32
    %42 = vector.broadcast %cst_52 : f32 to vector<2x8x1xf32>
    %43 = arith.divf %41, %42 : vector<2x8x1xf32>
    %44 = vector.broadcast %36 : vector<2x8x1xf32> to vector<2x8x32xf32>
    %45 = arith.subf %32, %44 : vector<2x8x32xf32>
    %cst_53 = arith.constant 9.99999997E-7 : f32
    %46 = vector.broadcast %cst_53 : f32 to vector<2x8x1xf32>
    %47 = arith.addf %43, %46 : vector<2x8x1xf32>
    %48 = math.rsqrt %47 : vector<2x8x1xf32>
    %49 = vector.broadcast %48 : vector<2x8x1xf32> to vector<2x8x32xf32>
    %50 = arith.mulf %45, %49 : vector<2x8x32xf32>
    %51 = vector.shape_cast %1 : vector<1x32xf32> to vector<1x1x32xf32>
    %52 = vector.broadcast %51 : vector<1x1x32xf32> to vector<2x8x32xf32>
    %53 = arith.mulf %50, %52 : vector<2x8x32xf32>
    %54 = vector.shape_cast %3 : vector<1x32xf32> to vector<1x1x32xf32>
    %55 = vector.broadcast %54 : vector<1x1x32xf32> to vector<2x8x32xf32>
    %56 = arith.addf %53, %55 : vector<2x8x32xf32>
    %57 = arith.truncf %56 : vector<2x8x32xf32> to vector<2x8x32xbf16>
    %58 = vector.shape_cast %57 : vector<2x8x32xbf16> to vector<16x32xbf16>
    %cst_54 = arith.constant dense<0.000000e+00> : vector<16x64xf32>
    %59 = tpu.matmul %58, %9, %cst_54 {dimension_numbers = #tpu.dot_dimension_numbers<[1], [0], [0], [1], [0, 0, 1, 1], [], []>} : vector<16x32xbf16>, vector<32x64xbf16>, vector<16x64xf32> -> vector<16x64xf32>
    %60 = vector.broadcast %11 : vector<1x64xf32> to vector<16x64xf32>
    %61 = arith.addf %59, %60 : vector<16x64xf32>
    %62 = vector.shape_cast %61 : vector<16x64xf32> to vector<2x8x64xf32>
    %63 = vector.extract_strided_slice %57 {offsets = [0, 0, 0], sizes = [2, 1, 32], strides = [1, 1, 1]} : vector<2x8x32xbf16> to vector<2x1x32xbf16>
    %64 = vector.shape_cast %63 : vector<2x1x32xbf16> to vector<2x32xbf16>
    %cst_55 = arith.constant dense<0.000000e+00> : vector<2x32xf32>
    %65 = tpu.matmul %64, %5, %cst_55 {dimension_numbers = #tpu.dot_dimension_numbers<[1], [0], [0], [1], [0, 0, 1, 1], [], []>} : vector<2x32xbf16>, vector<32x32xbf16>, vector<2x32xf32> -> vector<2x32xf32>
    %66 = vector.broadcast %7 : vector<1x32xf32> to vector<2x32xf32>
    %67 = arith.addf %65, %66 : vector<2x32xf32>
    %68 = vector.extract_strided_slice %62 {offsets = [0, 0, 0], sizes = [2, 8, 32], strides = [1, 1, 1]} : vector<2x8x64xf32> to vector<2x8x32xf32>
    %69 = vector.extract_strided_slice %62 {offsets = [0, 0, 32], sizes = [2, 8, 32], strides = [1, 1, 1]} : vector<2x8x64xf32> to vector<2x8x32xf32>
    %70 = vector.shape_cast %67 : vector<2x32xf32> to vector<2x1x32xf32>
    %71 = vector.broadcast %70 : vector<2x1x32xf32> to vector<2x8x32xf32>
    %72 = arith.mulf %71, %68 : vector<2x8x32xf32>
    %73 = vector.extract_strided_slice %32 {offsets = [0, 0, 0], sizes = [2, 1, 32], strides = [1, 1, 1]} : vector<2x8x32xf32> to vector<2x1x32xf32>
    %74 = vector.shape_cast %73 : vector<2x1x32xf32> to vector<2x32xf32>
    %75 = vector.broadcast %15 : vector<1x32xf32> to vector<2x32xf32>
    %76 = arith.addf %74, %75 : vector<2x32xf32>
    %77 = vector.extract_strided_slice %72 {offsets = [0, 0, 0], sizes = [2, 8, 8], strides = [1, 1, 1]} : vector<2x8x32xf32> to vector<2x8x8xf32>
    %cst_56 = arith.constant dense<0.000000e+00> : vector<2x8xf32>
    %78 = vector.multi_reduction <add>, %77, %cst_56 [2] : vector<2x8x8xf32> to vector<2x8xf32>
    %cst_57 = arith.constant 0.353553385 : f32
    %79 = vector.broadcast %cst_57 : f32 to vector<2x8xf32>
    %80 = arith.mulf %78, %79 : vector<2x8xf32>
    %cst_58 = arith.constant dense<0xFF800000> : vector<2xf32>
    %81 = vector.multi_reduction <maximumf>, %80, %cst_58 [1] : vector<2x8xf32> to vector<2xf32>
    %82 = vector.shape_cast %81 : vector<2xf32> to vector<2x1xf32>
    %83 = vector.broadcast %82 : vector<2x1xf32> to vector<2x8xf32>
    %84 = arith.subf %80, %83 : vector<2x8xf32>
    %85 = math.exp %84 : vector<2x8xf32>
    %cst_59 = arith.constant dense<0.000000e+00> : vector<2xf32>
    %86 = vector.multi_reduction <add>, %85, %cst_59 [1] : vector<2x8xf32> to vector<2xf32>
    %87 = vector.shape_cast %86 : vector<2xf32> to vector<2x1xf32>
    %88 = vector.broadcast %87 : vector<2x1xf32> to vector<2x8xf32>
    %89 = arith.divf %85, %88 : vector<2x8xf32>
    %90 = vector.shape_cast %89 : vector<2x8xf32> to vector<2x8x1xf32>
    %91 = vector.extract_strided_slice %69 {offsets = [0, 0, 0], sizes = [2, 8, 8], strides = [1, 1, 1]} : vector<2x8x32xf32> to vector<2x8x8xf32>
    %92 = vector.broadcast %90 : vector<2x8x1xf32> to vector<2x8x8xf32>
    %93 = arith.mulf %92, %91 : vector<2x8x8xf32>
    %cst_60 = arith.constant dense<0.000000e+00> : vector<2x8xf32>
    %94 = vector.multi_reduction <add>, %93, %cst_60 [1] : vector<2x8x8xf32> to vector<2x8xf32>
    %95 = arith.truncf %94 : vector<2x8xf32> to vector<2x8xbf16>
    %96 = vector.extract_strided_slice %13 {offsets = [0, 0], sizes = [8, 32], strides = [1, 1]} : vector<32x32xbf16> to vector<8x32xbf16>
    %cst_61 = arith.constant dense<0.000000e+00> : vector<2x32xf32>
    %97 = tpu.matmul %95, %96, %cst_61 {dimension_numbers = #tpu.dot_dimension_numbers<[1], [0], [0], [1], [0, 0, 1, 1], [], []>} : vector<2x8xbf16>, vector<8x32xbf16>, vector<2x32xf32> -> vector<2x32xf32>
    %98 = arith.addf %76, %97 : vector<2x32xf32>
    %99 = vector.extract_strided_slice %72 {offsets = [0, 0, 8], sizes = [2, 8, 8], strides = [1, 1, 1]} : vector<2x8x32xf32> to vector<2x8x8xf32>
    %cst_62 = arith.constant dense<0.000000e+00> : vector<2x8xf32>
    %100 = vector.multi_reduction <add>, %99, %cst_62 [2] : vector<2x8x8xf32> to vector<2x8xf32>
    %cst_63 = arith.constant 0.353553385 : f32
    %101 = vector.broadcast %cst_63 : f32 to vector<2x8xf32>
    %102 = arith.mulf %100, %101 : vector<2x8xf32>
    %cst_64 = arith.constant dense<0xFF800000> : vector<2xf32>
    %103 = vector.multi_reduction <maximumf>, %102, %cst_64 [1] : vector<2x8xf32> to vector<2xf32>
    %104 = vector.shape_cast %103 : vector<2xf32> to vector<2x1xf32>
    %105 = vector.broadcast %104 : vector<2x1xf32> to vector<2x8xf32>
    %106 = arith.subf %102, %105 : vector<2x8xf32>
    %107 = math.exp %106 : vector<2x8xf32>
    %cst_65 = arith.constant dense<0.000000e+00> : vector<2xf32>
    %108 = vector.multi_reduction <add>, %107, %cst_65 [1] : vector<2x8xf32> to vector<2xf32>
    %109 = vector.shape_cast %108 : vector<2xf32> to vector<2x1xf32>
    %110 = vector.broadcast %109 : vector<2x1xf32> to vector<2x8xf32>
    %111 = arith.divf %107, %110 : vector<2x8xf32>
    %112 = vector.shape_cast %111 : vector<2x8xf32> to vector<2x8x1xf32>
    %113 = vector.extract_strided_slice %69 {offsets = [0, 0, 8], sizes = [2, 8, 8], strides = [1, 1, 1]} : vector<2x8x32xf32> to vector<2x8x8xf32>
    %114 = vector.broadcast %112 : vector<2x8x1xf32> to vector<2x8x8xf32>
    %115 = arith.mulf %114, %113 : vector<2x8x8xf32>
    %cst_66 = arith.constant dense<0.000000e+00> : vector<2x8xf32>
    %116 = vector.multi_reduction <add>, %115, %cst_66 [1] : vector<2x8x8xf32> to vector<2x8xf32>
    %117 = arith.truncf %116 : vector<2x8xf32> to vector<2x8xbf16>
    %118 = vector.extract_strided_slice %13 {offsets = [8, 0], sizes = [8, 32], strides = [1, 1]} : vector<32x32xbf16> to vector<8x32xbf16>
    %cst_67 = arith.constant dense<0.000000e+00> : vector<2x32xf32>
    %119 = tpu.matmul %117, %118, %cst_67 {dimension_numbers = #tpu.dot_dimension_numbers<[1], [0], [0], [1], [0, 0, 1, 1], [], []>} : vector<2x8xbf16>, vector<8x32xbf16>, vector<2x32xf32> -> vector<2x32xf32>
    %120 = arith.addf %98, %119 : vector<2x32xf32>
    %121 = vector.extract_strided_slice %72 {offsets = [0, 0, 16], sizes = [2, 8, 8], strides = [1, 1, 1]} : vector<2x8x32xf32> to vector<2x8x8xf32>
    %cst_68 = arith.constant dense<0.000000e+00> : vector<2x8xf32>
    %122 = vector.multi_reduction <add>, %121, %cst_68 [2] : vector<2x8x8xf32> to vector<2x8xf32>
    %cst_69 = arith.constant 0.353553385 : f32
    %123 = vector.broadcast %cst_69 : f32 to vector<2x8xf32>
    %124 = arith.mulf %122, %123 : vector<2x8xf32>
    %cst_70 = arith.constant dense<0xFF800000> : vector<2xf32>
    %125 = vector.multi_reduction <maximumf>, %124, %cst_70 [1] : vector<2x8xf32> to vector<2xf32>
    %126 = vector.shape_cast %125 : vector<2xf32> to vector<2x1xf32>
    %127 = vector.broadcast %126 : vector<2x1xf32> to vector<2x8xf32>
    %128 = arith.subf %124, %127 : vector<2x8xf32>
    %129 = math.exp %128 : vector<2x8xf32>
    %cst_71 = arith.constant dense<0.000000e+00> : vector<2xf32>
    %130 = vector.multi_reduction <add>, %129, %cst_71 [1] : vector<2x8xf32> to vector<2xf32>
    %131 = vector.shape_cast %130 : vector<2xf32> to vector<2x1xf32>
    %132 = vector.broadcast %131 : vector<2x1xf32> to vector<2x8xf32>
    %133 = arith.divf %129, %132 : vector<2x8xf32>
    %134 = vector.shape_cast %133 : vector<2x8xf32> to vector<2x8x1xf32>
    %135 = vector.extract_strided_slice %69 {offsets = [0, 0, 16], sizes = [2, 8, 8], strides = [1, 1, 1]} : vector<2x8x32xf32> to vector<2x8x8xf32>
    %136 = vector.broadcast %134 : vector<2x8x1xf32> to vector<2x8x8xf32>
    %137 = arith.mulf %136, %135 : vector<2x8x8xf32>
    %cst_72 = arith.constant dense<0.000000e+00> : vector<2x8xf32>
    %138 = vector.multi_reduction <add>, %137, %cst_72 [1] : vector<2x8x8xf32> to vector<2x8xf32>
    %139 = arith.truncf %138 : vector<2x8xf32> to vector<2x8xbf16>
    %140 = vector.extract_strided_slice %13 {offsets = [16, 0], sizes = [8, 32], strides = [1, 1]} : vector<32x32xbf16> to vector<8x32xbf16>
    %cst_73 = arith.constant dense<0.000000e+00> : vector<2x32xf32>
    %141 = tpu.matmul %139, %140, %cst_73 {dimension_numbers = #tpu.dot_dimension_numbers<[1], [0], [0], [1], [0, 0, 1, 1], [], []>} : vector<2x8xbf16>, vector<8x32xbf16>, vector<2x32xf32> -> vector<2x32xf32>
    %142 = arith.addf %120, %141 : vector<2x32xf32>
    %143 = vector.extract_strided_slice %72 {offsets = [0, 0, 24], sizes = [2, 8, 8], strides = [1, 1, 1]} : vector<2x8x32xf32> to vector<2x8x8xf32>
    %cst_74 = arith.constant dense<0.000000e+00> : vector<2x8xf32>
    %144 = vector.multi_reduction <add>, %143, %cst_74 [2] : vector<2x8x8xf32> to vector<2x8xf32>
    %cst_75 = arith.constant 0.353553385 : f32
    %145 = vector.broadcast %cst_75 : f32 to vector<2x8xf32>
    %146 = arith.mulf %144, %145 : vector<2x8xf32>
    %cst_76 = arith.constant dense<0xFF800000> : vector<2xf32>
    %147 = vector.multi_reduction <maximumf>, %146, %cst_76 [1] : vector<2x8xf32> to vector<2xf32>
    %148 = vector.shape_cast %147 : vector<2xf32> to vector<2x1xf32>
    %149 = vector.broadcast %148 : vector<2x1xf32> to vector<2x8xf32>
    %150 = arith.subf %146, %149 : vector<2x8xf32>
    %151 = math.exp %150 : vector<2x8xf32>
    %cst_77 = arith.constant dense<0.000000e+00> : vector<2xf32>
    %152 = vector.multi_reduction <add>, %151, %cst_77 [1] : vector<2x8xf32> to vector<2xf32>
    %153 = vector.shape_cast %152 : vector<2xf32> to vector<2x1xf32>
    %154 = vector.broadcast %153 : vector<2x1xf32> to vector<2x8xf32>
    %155 = arith.divf %151, %154 : vector<2x8xf32>
    %156 = vector.shape_cast %155 : vector<2x8xf32> to vector<2x8x1xf32>
    %157 = vector.extract_strided_slice %69 {offsets = [0, 0, 24], sizes = [2, 8, 8], strides = [1, 1, 1]} : vector<2x8x32xf32> to vector<2x8x8xf32>
    %158 = vector.broadcast %156 : vector<2x8x1xf32> to vector<2x8x8xf32>
    %159 = arith.mulf %158, %157 : vector<2x8x8xf32>
    %cst_78 = arith.constant dense<0.000000e+00> : vector<2x8xf32>
    %160 = vector.multi_reduction <add>, %159, %cst_78 [1] : vector<2x8x8xf32> to vector<2x8xf32>
    %161 = arith.truncf %160 : vector<2x8xf32> to vector<2x8xbf16>
    %162 = vector.extract_strided_slice %13 {offsets = [24, 0], sizes = [8, 32], strides = [1, 1]} : vector<32x32xbf16> to vector<8x32xbf16>
    %cst_79 = arith.constant dense<0.000000e+00> : vector<2x32xf32>
    %163 = tpu.matmul %161, %162, %cst_79 {dimension_numbers = #tpu.dot_dimension_numbers<[1], [0], [0], [1], [0, 0, 1, 1], [], []>} : vector<2x8xbf16>, vector<8x32xbf16>, vector<2x32xf32> -> vector<2x32xf32>
    %164 = arith.addf %142, %163 : vector<2x32xf32>
    %cst_80 = arith.constant dense<0.000000e+00> : vector<2xf32>
    %165 = vector.multi_reduction <add>, %164, %cst_80 [1] : vector<2x32xf32> to vector<2xf32>
    %166 = vector.shape_cast %165 : vector<2xf32> to vector<2x1xf32>
    %cst_81 = arith.constant 3.200000e+01 : f32
    %167 = vector.broadcast %cst_81 : f32 to vector<2x1xf32>
    %168 = arith.divf %166, %167 : vector<2x1xf32>
    %169 = vector.broadcast %168 : vector<2x1xf32> to vector<2x32xf32>
    %170 = arith.subf %164, %169 : vector<2x32xf32>
    %171 = arith.mulf %170, %170 : vector<2x32xf32>
    %cst_82 = arith.constant dense<0.000000e+00> : vector<2xf32>
    %172 = vector.multi_reduction <add>, %171, %cst_82 [1] : vector<2x32xf32> to vector<2xf32>
    %173 = vector.shape_cast %172 : vector<2xf32> to vector<2x1xf32>
    %cst_83 = arith.constant 3.200000e+01 : f32
    %174 = vector.broadcast %cst_83 : f32 to vector<2x1xf32>
    %175 = arith.divf %173, %174 : vector<2x1xf32>
    %176 = vector.broadcast %168 : vector<2x1xf32> to vector<2x32xf32>
    %177 = arith.subf %164, %176 : vector<2x32xf32>
    %cst_84 = arith.constant 9.99999997E-7 : f32
    %178 = vector.broadcast %cst_84 : f32 to vector<2x1xf32>
    %179 = arith.addf %175, %178 : vector<2x1xf32>
    %180 = math.rsqrt %179 : vector<2x1xf32>
    %181 = vector.broadcast %180 : vector<2x1xf32> to vector<2x32xf32>
    %182 = arith.mulf %177, %181 : vector<2x32xf32>
    %183 = vector.broadcast %17 : vector<1x32xf32> to vector<2x32xf32>
    %184 = arith.mulf %182, %183 : vector<2x32xf32>
    %185 = vector.broadcast %19 : vector<1x32xf32> to vector<2x32xf32>
    %186 = arith.addf %184, %185 : vector<2x32xf32>
    %187 = arith.truncf %186 : vector<2x32xf32> to vector<2x32xbf16>
    %cst_85 = arith.constant dense<0.000000e+00> : vector<2x128xf32>
    %188 = tpu.matmul %187, %21, %cst_85 {dimension_numbers = #tpu.dot_dimension_numbers<[1], [0], [0], [1], [0, 0, 1, 1], [], []>} : vector<2x32xbf16>, vector<32x128xbf16>, vector<2x128xf32> -> vector<2x128xf32>
    %189 = vector.broadcast %23 : vector<1x128xf32> to vector<2x128xf32>
    %190 = arith.addf %188, %189 : vector<2x128xf32>
    %cst_86 = arith.constant 5.000000e-01 : f32
    %191 = vector.broadcast %cst_86 : f32 to vector<2x128xf32>
    %192 = arith.mulf %191, %190 : vector<2x128xf32>
    %cst_87 = arith.constant 0.707106769 : f32
    %193 = vector.broadcast %cst_87 : f32 to vector<2x128xf32>
    %194 = arith.mulf %190, %193 : vector<2x128xf32>
    %cst_88 = arith.constant 0.000000e+00 : f32
    %195 = vector.broadcast %cst_88 : f32 to vector<2x128xf32>
    %196 = arith.cmpf olt, %194, %195 : vector<2x128xf32>
    %cst_89 = arith.constant -1.000000e+00 : f32
    %cst_90 = arith.constant 1.000000e+00 : f32
    %197 = vector.broadcast %cst_89 : f32 to vector<2x128xf32>
    %198 = vector.broadcast %cst_90 : f32 to vector<2x128xf32>
    %199 = arith.select %196, %197, %198 : vector<2x128xi1>, vector<2x128xf32>
    %200 = math.absf %194 : vector<2x128xf32>
    %cst_91 = arith.constant 0.327591091 : f32
    %201 = vector.broadcast %cst_91 : f32 to vector<2x128xf32>
    %202 = arith.mulf %201, %200 : vector<2x128xf32>
    %cst_92 = arith.constant 1.000000e+00 : f32
    %203 = vector.broadcast %cst_92 : f32 to vector<2x128xf32>
    %204 = arith.addf %203, %202 : vector<2x128xf32>
    %cst_93 = arith.constant 1.000000e+00 : f32
    %205 = vector.broadcast %cst_93 : f32 to vector<2x128xf32>
    %206 = arith.divf %205, %204 : vector<2x128xf32>
    %cst_94 = arith.constant 1.06140542 : f32
    %207 = vector.broadcast %cst_94 : f32 to vector<2x128xf32>
    %208 = arith.mulf %207, %206 : vector<2x128xf32>
    %cst_95 = arith.constant -1.45315206 : f32
    %209 = vector.broadcast %cst_95 : f32 to vector<2x128xf32>
    %210 = arith.addf %208, %209 : vector<2x128xf32>
    %211 = arith.mulf %210, %206 : vector<2x128xf32>
    %cst_96 = arith.constant 1.42141378 : f32
    %212 = vector.broadcast %cst_96 : f32 to vector<2x128xf32>
    %213 = arith.addf %211, %212 : vector<2x128xf32>
    %214 = arith.mulf %213, %206 : vector<2x128xf32>
    %cst_97 = arith.constant -0.284496725 : f32
    %215 = vector.broadcast %cst_97 : f32 to vector<2x128xf32>
    %216 = arith.addf %214, %215 : vector<2x128xf32>
    %217 = arith.mulf %216, %206 : vector<2x128xf32>
    %cst_98 = arith.constant 0.254829586 : f32
    %218 = vector.broadcast %cst_98 : f32 to vector<2x128xf32>
    %219 = arith.addf %217, %218 : vector<2x128xf32>
    %220 = arith.mulf %219, %206 : vector<2x128xf32>
    %cst_99 = arith.constant 0.000000e+00 : f32
    %221 = vector.broadcast %cst_99 : f32 to vector<2x128xf32>
    %222 = arith.subf %221, %200 : vector<2x128xf32>
    %223 = arith.mulf %222, %200 : vector<2x128xf32>
    %224 = math.exp %223 : vector<2x128xf32>
    %225 = arith.mulf %220, %224 : vector<2x128xf32>
    %cst_100 = arith.constant 1.000000e+00 : f32
    %226 = vector.broadcast %cst_100 : f32 to vector<2x128xf32>
    %227 = arith.subf %226, %225 : vector<2x128xf32>
    %228 = arith.mulf %199, %227 : vector<2x128xf32>
    %cst_101 = arith.constant 1.000000e+00 : f32
    %229 = vector.broadcast %cst_101 : f32 to vector<2x128xf32>
    %230 = arith.addf %229, %228 : vector<2x128xf32>
    %231 = arith.mulf %192, %230 : vector<2x128xf32>
    %232 = arith.truncf %231 : vector<2x128xf32> to vector<2x128xbf16>
    %cst_102 = arith.constant dense<0.000000e+00> : vector<2x32xf32>
    %233 = tpu.matmul %232, %25, %cst_102 {dimension_numbers = #tpu.dot_dimension_numbers<[1], [0], [0], [1], [0, 0, 1, 1], [], []>} : vector<2x128xbf16>, vector<128x32xbf16>, vector<2x32xf32> -> vector<2x32xf32>
    %234 = arith.addf %164, %233 : vector<2x32xf32>
    %235 = vector.broadcast %27 : vector<1x32xf32> to vector<2x32xf32>
    %236 = arith.addf %234, %235 : vector<2x32xf32>
    %cst_103 = arith.constant dense<0.000000e+00> : vector<2xf32>
    %237 = vector.multi_reduction <add>, %236, %cst_103 [1] : vector<2x32xf32> to vector<2xf32>
    %238 = vector.shape_cast %237 : vector<2xf32> to vector<2x1xf32>
    %cst_104 = arith.constant 3.200000e+01 : f32
    %239 = vector.broadcast %cst_104 : f32 to vector<2x1xf32>
    %240 = arith.divf %238, %239 : vector<2x1xf32>
    %241 = vector.broadcast %240 : vector<2x1xf32> to vector<2x32xf32>
    %242 = arith.subf %236, %241 : vector<2x32xf32>
    %243 = arith.mulf %242, %242 : vector<2x32xf32>
    %cst_105 = arith.constant dense<0.000000e+00> : vector<2xf32>
    %244 = vector.multi_reduction <add>, %243, %cst_105 [1] : vector<2x32xf32> to vector<2xf32>
    %245 = vector.shape_cast %244 : vector<2xf32> to vector<2x1xf32>
    %cst_106 = arith.constant 3.200000e+01 : f32
    %246 = vector.broadcast %cst_106 : f32 to vector<2x1xf32>
    %247 = arith.divf %245, %246 : vector<2x1xf32>
    %248 = vector.broadcast %240 : vector<2x1xf32> to vector<2x32xf32>
    %249 = arith.subf %236, %248 : vector<2x32xf32>
    %cst_107 = arith.constant 9.99999997E-7 : f32
    %250 = vector.broadcast %cst_107 : f32 to vector<2x1xf32>
    %251 = arith.addf %247, %250 : vector<2x1xf32>
    %252 = math.rsqrt %251 : vector<2x1xf32>
    %253 = vector.broadcast %252 : vector<2x1xf32> to vector<2x32xf32>
    %254 = arith.mulf %249, %253 : vector<2x32xf32>
    %255 = vector.broadcast %29 : vector<1x32xf32> to vector<2x32xf32>
    %256 = arith.mulf %254, %255 : vector<2x32xf32>
    %257 = vector.broadcast %31 : vector<1x32xf32> to vector<2x32xf32>
    %258 = arith.addf %256, %257 : vector<2x32xf32>
    %c0_108 = arith.constant 0 : index
    %c0_109 = arith.constant 0 : index
    %259 = vector.load %arg21[%c0_108, %c0_109] : memref<2x32xf32, #tpu.memory_space<vmem>>, vector<2x32xf32>
    tpu.vector_store %arg21[%c0_108, %c0_109], %258 {strides = array<i32>} : memref<2x32xf32, #tpu.memory_space<vmem>>, vector<2x32xf32>,
    %260 = arith.index_cast %arg0 : i32 to index
    %c0_110 = arith.constant 0 : index
    %c0_111 = arith.constant 0 : index
    %261 = vector.load %arg23[%260, %c0_110, %c0_111] : memref<1x2x32xf32, #tpu.memory_space<vmem>>, vector<1x2x32xf32>
    %262 = vector.shape_cast %261 : vector<1x2x32xf32> to vector<2x32xf32>
    %263 = vector.shape_cast %258 : vector<2x32xf32> to vector<1x2x32xf32>
    tpu.vector_store %arg23[%260, %c0_110, %c0_111], %263 {strides = array<i32>} : memref<1x2x32xf32, #tpu.memory_space<vmem>>, vector<1x2x32xf32>,
    %c0_i32 = arith.constant 0 : i32
    %264 = arith.cmpi eq, %arg0, %c0_i32 : i32
    %265 = arith.extui %264 : i1 to i32
    %c0_i32_112 = arith.constant 0 : i32
    %266 = arith.cmpi ne, %265, %c0_i32_112 : i32
    scf.if %266 {
      %c0_113 = arith.constant 0 : index
      %c0_114 = arith.constant 0 : index
      %c0_115 = arith.constant 0 : index
      %267 = vector.load %arg23[%c0_113, %c0_114, %c0_115] : memref<1x2x32xf32, #tpu.memory_space<vmem>>, vector<1x2x32xf32>
      %268 = vector.shape_cast %267 : vector<1x2x32xf32> to vector<2x32xf32>
      %cst_116 = arith.constant dense<0.000000e+00> : vector<32xf32>
      %269 = vector.multi_reduction <add>, %268, %cst_116 [0] : vector<2x32xf32> to vector<32xf32>
      %270 = vector.shape_cast %269 : vector<32xf32> to vector<1x32xf32>
      %cst_117 = arith.constant 2.000000e+00 : f32
      %271 = vector.broadcast %cst_117 : f32 to vector<1x32xf32>
      %272 = arith.divf %270, %271 : vector<1x32xf32>
      %273 = vector.broadcast %272 : vector<1x32xf32> to vector<2x32xf32>
      %274 = arith.subf %268, %273 : vector<2x32xf32>
      %275 = arith.mulf %274, %274 : vector<2x32xf32>
      %cst_118 = arith.constant dense<0.000000e+00> : vector<32xf32>
      %276 = vector.multi_reduction <add>, %275, %cst_118 [0] : vector<2x32xf32> to vector<32xf32>
      %277 = vector.shape_cast %276 : vector<32xf32> to vector<1x32xf32>
      %cst_119 = arith.constant 2.000000e+00 : f32
      %278 = vector.broadcast %cst_119 : f32 to vector<1x32xf32>
      %279 = arith.divf %277, %278 : vector<1x32xf32>
      %280 = vector.broadcast %272 : vector<1x32xf32> to vector<2x32xf32>
      %281 = arith.subf %268, %280 : vector<2x32xf32>
      %cst_120 = arith.constant 9.99999974E-6 : f32
      %282 = vector.broadcast %cst_120 : f32 to vector<1x32xf32>
      %283 = arith.addf %279, %282 : vector<1x32xf32>
      %284 = math.rsqrt %283 : vector<1x32xf32>
      %285 = vector.broadcast %284 : vector<1x32xf32> to vector<2x32xf32>
      %286 = arith.mulf %281, %285 : vector<2x32xf32>
      %c0_121 = arith.constant 0 : index
      %c0_122 = arith.constant 0 : index
      %287 = vector.load %arg18[%c0_121, %c0_122] : memref<1x32xf32, #tpu.memory_space<vmem>>, vector<1x32xf32>
      %288 = vector.broadcast %287 : vector<1x32xf32> to vector<2x32xf32>
      %289 = arith.mulf %286, %288 : vector<2x32xf32>
      %c0_123 = arith.constant 0 : index
      %c0_124 = arith.constant 0 : index
      %290 = vector.load %arg19[%c0_123, %c0_124] : memref<1x32xf32, #tpu.memory_space<vmem>>, vector<1x32xf32>
      %291 = vector.broadcast %290 : vector<1x32xf32> to vector<2x32xf32>
      %292 = arith.addf %289, %291 : vector<2x32xf32>
      %293 = arith.truncf %292 : vector<2x32xf32> to vector<2x32xbf16>
      %c0_125 = arith.constant 0 : index
      %c0_126 = arith.constant 0 : index
      %294 = vector.load %arg20[%c0_125, %c0_126] : memref<32x128xbf16, #tpu.memory_space<vmem>>, vector<32x128xbf16>
      %cst_127 = arith.constant dense<0.000000e+00> : vector<2x128xf32>
      %295 = tpu.matmul %293, %294, %cst_127 {dimension_numbers = #tpu.dot_dimension_numbers<[1], [0], [0], [1], [0, 0, 1, 1], [], []>} : vector<2x32xbf16>, vector<32x128xbf16>, vector<2x128xf32> -> vector<2x128xf32>
      %c0_128 = arith.constant 0 : index
      %c0_129 = arith.constant 0 : index
      %296 = vector.load %arg22[%c0_128, %c0_129] : memref<2x128xf32, #tpu.memory_space<vmem>>, vector<2x128xf32>
      tpu.vector_store %arg22[%c0_128, %c0_129], %295 {strides = array<i32>} : memref<2x128xf32, #tpu.memory_space<vmem>>, vector<2x128xf32>,
    } else {
    }
    return
  }
  func.func @transform_0(%arg0: i32) -> (i32, i32, i32) {
    %c0_i32 = arith.constant 0 : i32
    %c0_i32_0 = arith.constant 0 : i32
    %c0_i32_1 = arith.constant 0 : i32
    return %arg0, %c0_i32, %c0_i32_0 : i32, i32, i32
  }
  func.func @transform_1(%arg0: i32) -> (i32, i32, i32) {
    %c0_i32 = arith.constant 0 : i32
    %c0_i32_0 = arith.constant 0 : i32
    %c0_i32_1 = arith.constant 0 : i32
    %c0_i32_2 = arith.constant 0 : i32
    return %c0_i32, %c0_i32_0, %c0_i32_1 : i32, i32, i32
  }
  func.func @transform_2(%arg0: i32) -> (i32, i32, i32) {
    %c0_i32 = arith.constant 0 : i32
    %c0_i32_0 = arith.constant 0 : i32
    %c0_i32_1 = arith.constant 0 : i32
    %c0_i32_2 = arith.constant 0 : i32
    return %c0_i32, %c0_i32_0, %c0_i32_1 : i32, i32, i32
  }
  func.func @transform_3(%arg0: i32) -> (i32, i32, i32) {
    %c0_i32 = arith.constant 0 : i32
    %c0_i32_0 = arith.constant 0 : i32
    %c0_i32_1 = arith.constant 0 : i32
    %c0_i32_2 = arith.constant 0 : i32
    return %c0_i32, %c0_i32_0, %c0_i32_1 : i32, i32, i32
  }
  func.func @transform_4(%arg0: i32) -> (i32, i32, i32) {
    %c0_i32 = arith.constant 0 : i32
    %c0_i32_0 = arith.constant 0 : i32
    %c0_i32_1 = arith.constant 0 : i32
    %c0_i32_2 = arith.constant 0 : i32
    return %c0_i32, %c0_i32_0, %c0_i32_1 : i32, i32, i32
  }
  func.func @transform_5(%arg0: i32) -> (i32, i32, i32) {
    %c0_i32 = arith.constant 0 : i32
    %c0_i32_0 = arith.constant 0 : i32
    %c0_i32_1 = arith.constant 0 : i32
    %c0_i32_2 = arith.constant 0 : i32
    return %c0_i32, %c0_i32_0, %c0_i32_1 : i32, i32, i32
  }
  func.func @transform_6(%arg0: i32) -> (i32, i32, i32) {
    %c0_i32 = arith.constant 0 : i32
    %c0_i32_0 = arith.constant 0 : i32
    %c0_i32_1 = arith.constant 0 : i32
    %c0_i32_2 = arith.constant 0 : i32
    return %c0_i32, %c0_i32_0, %c0_i32_1 : i32, i32, i32
  }
  func.func @transform_7(%arg0: i32) -> (i32, i32, i32) {
    %c0_i32 = arith.constant 0 : i32
    %c0_i32_0 = arith.constant 0 : i32
    %c0_i32_1 = arith.constant 0 : i32
    %c0_i32_2 = arith.constant 0 : i32
    return %c0_i32, %c0_i32_0, %c0_i32_1 : i32, i32, i32
  }
  func.func @transform_8(%arg0: i32) -> (i32, i32, i32) {
    %c0_i32 = arith.constant 0 : i32
    %c0_i32_0 = arith.constant 0 : i32
    %c0_i32_1 = arith.constant 0 : i32
    %c0_i32_2 = arith.constant 0 : i32
    return %c0_i32, %c0_i32_0, %c0_i32_1 : i32, i32, i32
  }
  func.func @transform_9(%arg0: i32) -> (i32, i32, i32) {
    %c0_i32 = arith.constant 0 : i32
    %c0_i32_0 = arith.constant 0 : i32
    %c0_i32_1 = arith.constant 0 : i32
    %c0_i32_2 = arith.constant 0 : i32
    return %c0_i32, %c0_i32_0, %c0_i32_1 : i32, i32, i32
  }
  func.func @transform_10(%arg0: i32) -> (i32, i32, i32) {
    %c0_i32 = arith.constant 0 : i32
    %c0_i32_0 = arith.constant 0 : i32
    %c0_i32_1 = arith.constant 0 : i32
    %c0_i32_2 = arith.constant 0 : i32
    return %c0_i32, %c0_i32_0, %c0_i32_1 : i32, i32, i32
  }
  func.func @transform_11(%arg0: i32) -> (i32, i32, i32) {
    %c0_i32 = arith.constant 0 : i32
    %c0_i32_0 = arith.constant 0 : i32
    %c0_i32_1 = arith.constant 0 : i32
    %c0_i32_2 = arith.constant 0 : i32
    return %c0_i32, %c0_i32_0, %c0_i32_1 : i32, i32, i32
  }
  func.func @transform_12(%arg0: i32) -> (i32, i32, i32) {
    %c0_i32 = arith.constant 0 : i32
    %c0_i32_0 = arith.constant 0 : i32
    %c0_i32_1 = arith.constant 0 : i32
    %c0_i32_2 = arith.constant 0 : i32
    return %c0_i32, %c0_i32_0, %c0_i32_1 : i32, i32, i32
  }
  func.func @transform_13(%arg0: i32) -> (i32, i32, i32) {
    %c0_i32 = arith.constant 0 : i32
    %c0_i32_0 = arith.constant 0 : i32
    %c0_i32_1 = arith.constant 0 : i32
    %c0_i32_2 = arith.constant 0 : i32
    return %c0_i32, %c0_i32_0, %c0_i32_1 : i32, i32, i32
  }
  func.func @transform_14(%arg0: i32) -> (i32, i32, i32) {
    %c0_i32 = arith.constant 0 : i32
    %c0_i32_0 = arith.constant 0 : i32
    %c0_i32_1 = arith.constant 0 : i32
    %c0_i32_2 = arith.constant 0 : i32
    return %c0_i32, %c0_i32_0, %c0_i32_1 : i32, i32, i32
  }
  func.func @transform_15(%arg0: i32) -> (i32, i32, i32) {
    %c0_i32 = arith.constant 0 : i32
    %c0_i32_0 = arith.constant 0 : i32
    %c0_i32_1 = arith.constant 0 : i32
    %c0_i32_2 = arith.constant 0 : i32
    return %c0_i32, %c0_i32_0, %c0_i32_1 : i32, i32, i32
  }
  func.func @transform_16(%arg0: i32) -> (i32, i32, i32) {
    %c0_i32 = arith.constant 0 : i32
    %c0_i32_0 = arith.constant 0 : i32
    %c0_i32_1 = arith.constant 0 : i32
    %c0_i32_2 = arith.constant 0 : i32
    return %c0_i32, %c0_i32_0, %c0_i32_1 : i32, i32, i32
  }
  func.func @transform_17(%arg0: i32) -> (i32, i32) {
    %c0_i32 = arith.constant 0 : i32
    %c0_i32_0 = arith.constant 0 : i32
    %c0_i32_1 = arith.constant 0 : i32
    return %c0_i32, %c0_i32_0 : i32, i32
  }
  func.func @transform_18(%arg0: i32) -> (i32, i32) {
    %c0_i32 = arith.constant 0 : i32
    %c0_i32_0 = arith.constant 0 : i32
    %c0_i32_1 = arith.constant 0 : i32
    return %c0_i32, %c0_i32_0 : i32, i32
  }
  func.func @transform_19(%arg0: i32) -> (i32, i32) {
    %c0_i32 = arith.constant 0 : i32
    %c0_i32_0 = arith.constant 0 : i32
    %c0_i32_1 = arith.constant 0 : i32
    return %c0_i32, %c0_i32_0 : i32, i32
  }
  func.func @transform_20(%arg0: i32) -> (i32, i32) {
    %c0_i32 = arith.constant 0 : i32
    %c0_i32_0 = arith.constant 0 : i32
    return %arg0, %c0_i32 : i32, i32
  }
  func.func @transform_21(%arg0: i32) -> (i32, i32) {
    %c0_i32 = arith.constant 0 : i32
    %c0_i32_0 = arith.constant 0 : i32
    %c0_i32_1 = arith.constant 0 : i32
    return %c0_i32, %c0_i32_0 : i32, i32
  }
}

</mosaic_0001>

<bundles_post_ra>
// kernel: tcip_forward.1
= control target key start
LH: loop header
LB: loop body
LE: loop exit
PB: predicated region body
PF: predicated region fallthrough
CT: control target
= control target key end

     0   :  { %s2305_s0 = inlined_call_operand.vmem [shape: f32[2,8,32], index: 0, kind: input, shape index: {}]   ;;  %s2306_s1 = inlined_call_operand.vmem [shape: f32[2,1,32], index: 1, kind: input, shape index: {}]   ;;  %s2307_s2 = inlined_call_operand.vmem [shape: f32[2,1,32], index: 2, kind: input, shape index: {}]   ;;  %s2308_s3 = inlined_call_operand.vmem [shape: bf16[2,32,32], index: 3, kind: input, shape index: {}]   ;;  %s2309_s4 = inlined_call_operand.vmem [shape: f32[2,1,32], index: 4, kind: input, shape index: {}]   ;;  %s2310_s5 = inlined_call_operand.vmem [shape: bf16[2,32,64], index: 5, kind: input, shape index: {}]   ;;  %s2311_s6 = inlined_call_operand.vmem [shape: f32[2,1,64], index: 6, kind: input, shape index: {}]   ;;  %s2312_s7 = inlined_call_operand.vmem [shape: bf16[2,32,32], index: 7, kind: input, shape index: {}]   ;;  %s2313_s8 = inlined_call_operand.vmem [shape: f32[2,1,32], index: 8, kind: input, shape index: {}]   ;;  %s2314_s9 = inlined_call_operand.vmem [shape: f32[2,1,32], index: 9, kind: input, shape index: {}]   ;;  %s2315_s10 = inlined_call_operand.vmem [shape: f32[2,1,32], index: 10, kind: input, shape index: {}]   ;;  %s2316_s11 = inlined_call_operand.vmem [shape: bf16[2,32,128], index: 11, kind: input, shape index: {}]   ;;  %s2317_s12 = inlined_call_operand.hbm [shape: f32[2,1,128], index: 12, kind: input, shape index: {}]   ;;  %s2318_s13 = inlined_call_operand.vmem [shape: bf16[2,128,32], index: 13, kind: input, shape index: {}]   ;;  %s2319_s14 = inlined_call_operand.hbm [shape: f32[2,1,32], index: 14, kind: input, shape index: {}]   ;;  %s2320_s15 = inlined_call_operand.vmem [shape: f32[2,1,32], index: 15, kind: input, shape index: {}]   ;;  %s2321_s16 = inlined_call_operand.vmem [shape: f32[2,1,32], index: 16, kind: input, shape index: {}]   ;;  %s2322_s17 = inlined_call_operand.vmem [shape: f32[1,32], index: 17, kind: input, shape index: {}]   ;;  %s2323_s18 = inlined_call_operand.vmem [shape: f32[1,32], index: 18, kind: input, shape index: {}]   ;;  %s2324_s19 = inlined_call_operand.vmem [shape: bf16[32,128], index: 19, kind: input, shape index: {}]   ;;  %s2325_s20 = inlined_call_operand.hbm [shape: f32[2,32], index: 20, kind: output, shape index: {0}]   ;;  %s2326_s21 = inlined_call_operand.hbm [shape: f32[2,128], index: 21, kind: output, shape index: {1}]  }
   0x1   :  { %2330 = sst [smem:[#allocation15_spill]] %s2305_s0 }
   0x2   :  { %2331 = sst [smem:[#allocation16_spill]] %s2306_s1 }
   0x3   :  { %2332 = sst [smem:[#allocation17_spill]] %s2307_s2 }
   0x4   :  { %2333 = sst [smem:[#allocation18_spill]] %s2308_s3 }
   0x5   :  { %2334 = sst [smem:[#allocation19_spill]] %s2309_s4 }
   0x6   :  { %2335 = sst [smem:[#allocation20_spill]] %s2310_s5 }
   0x7   :  { %27 = vsyncpa [#allocation4], 0 }
   0x8   :  { %28 = vsyncpa [#allocation7], 0 }
   0x9   :  { %29 = vsyncpa [#allocation5], 0 }
   0xa   :  { %30 = vsyncpa [#allocation10], 0  ;;  %s1809_s2 = smov [#allocation3]   ;;  %s1810_s26 = smov [#allocation6]  }
   0xb   :  { %s61_s25 = sshll.u32 %s1809_s2, 4  ;;  %s73_s27 = sshll.u32 %s1810_s26, 4  ;;  %s62_s25 = int_to_ptr.vmem [resolvable:$true] %s61_s25  ;;  %s1935_s27 = int_to_ptr.vmem [resolvable:$true] %s73_s27 }
   0xc   :  { %s1713_s29 = scalar_lea.hbm %s2317_s12, 16  ;;  %s1715_s22 = scalar_lea.hbm %s2317_s12, 32 }
   0xd   :  { %p1714_p0 = scmp.ne.s32.totalorder %s2317_s12, %s1713_s29  ;;  %p1716_p1 = scmp.lt.u32.totalorder %s1715_s22, %s1713_s29 }
   0xe   :  { %p1717_p2 = scmp.lt.u32.totalorder %s1713_s29, %s2317_s12 }
  0x10   :  { %p1718_p3 = por %p1717_p2, %p1716_p1 }
  0x12   :  { %p1719_p4 = pnand %p1718_p3, %p1714_p0 }
  0x14   :  { %1722 = shalt.err (!%p1719_p4)
}
  0x15   :  { %s1723_s24 = scalar_lea.vmem %s62_s25, 16  ;;  %s1727_s2 = scalar_lea.vmem %s62_s25, 32 }
  0x16   :  { %p1724_p5 = scmp.ne.s32.totalorder %s62_s25, %s1723_s24  ;;  %p1728_p6 = scmp.lt.s32.totalorder %s62_s25, %s62_s25 }
  0x17   :  { %p1729_p7 = scmp.lt.s32.totalorder %s1727_s2, %s1723_s24 }
  0x19   :  { %p1730_p8 = por %p1729_p7, %p1728_p6 }
  0x1b   :  { %p1731_p9 = pnand %p1730_p8, %p1724_p5 }
  0x1d   :  { %1734 = shalt.err (!%p1731_p9)
}
  0x1e   :  { %64 = dma.hbm_to_vmem [thread:$0]  %s2317_s12, 16, %s62_s25, [#allocation4]  }
  0x1f   :  { %s1735_s4 = scalar_lea.hbm %s2319_s14, 16  ;;  %s1737_s23 = scalar_lea.hbm %s2319_s14, 32 }
  0x20   :  { %p1736_p10 = scmp.ne.s32.totalorder %s2319_s14, %s1735_s4  ;;  %p1738_p11 = scmp.lt.u32.totalorder %s1737_s23, %s1735_s4 }
  0x21   :  { %p1739_p12 = scmp.lt.u32.totalorder %s1735_s4, %s2319_s14 }
  0x23   :  { %p1740_p13 = por %p1739_p12, %p1738_p11 }
  0x25   :  { %p1741_p0 = pnand %p1740_p13, %p1736_p10 }
  0x27   :  { %1744 = shalt.err (!%p1741_p0)
}
  0x28   :  { %s1745_s12 = scalar_lea.vmem %s1935_s27, 16  ;;  %s1749_s25 = scalar_lea.vmem %s1935_s27, 32 }
  0x29   :  { %p1746_p1 = scmp.ne.s32.totalorder %s1935_s27, %s1745_s12  ;;  %p1750_p2 = scmp.lt.s32.totalorder %s1935_s27, %s1935_s27 }
  0x2a   :  { %p1751_p3 = scmp.lt.s32.totalorder %s1749_s25, %s1745_s12 }
  0x2c   :  { %p1752_p4 = por %p1751_p3, %p1750_p2 }
  0x2e   :  { %p1753_p5 = pnand %p1752_p4, %p1746_p1 }
  0x30   :  { %1756 = shalt.err (!%p1753_p5)
}
  0x31   :  { %76 = dma.hbm_to_vmem [thread:$0]  %s2319_s14, 16, %s1935_s27, [#allocation7]  }
  0x32   :  { %1801 = dma.done.wait [#allocation4], 16  }
  0x33   :  { %1802 = vsyncadd [#allocation4], 4294967280 }
  0x34   :  { %1803 = dma.done.wait [#allocation7], 16  }
  0x35   :  { %1804 = vsyncadd [#allocation7], 4294967280  ;;  %vm139_vm0 = vcmask 261120   ;;  %s2336_s0 = sld [smem:[#allocation15_spill]]  ;;  %s2337_s30 = sld [smem:[#allocation20_spill]]  ;;  %v1811_v15 = vmov 0.0   ;;  %v321_v43 = vlaneseq }
  0x36   :  { %1557 = vmatprep.subr.bf16.mxu0 %v1811_v15  ;;  %1579 = vmatprep.subr.bf16.mxu1 %v1811_v15  ;;  %vm1812_vm1 = vmmov 0   ;;  %s2338_s24 = sld [smem:[#allocation16_spill]]  ;;  %s2339_s2 = sld [smem:[#allocation17_spill]]  ;;  %vm259_vm2 = vcmask 1041409   ;;  %v1813_v47 = vmov 1966171168  }
  0x37   :  { %1561 = vmatprep.mubr.msk.bf16.mxu0 %vm1812_vm1, %v1811_v15  ;;  %1581 = vmatprep.mubr.msk.bf16.mxu1 %vm1812_vm1, %v1811_v15  ;;  %s2340_s28 = sld [smem:[#allocation18_spill]]  ;;  %v2026_v44 = vshrl.u32 %v321_v43, 7  ;;  %v372_v45 = vand.u32 127, %v321_v43  ;;  %v319_v48 = vunpack.c.l.s4 %v1813_v47  ;;  %s2341_s27 = sld [smem:[#allocation19_spill]]  ;;  %v1491_v63 = vld [vmem:[%s2311_s6] ss:$0 sm:$0xff] }
  0x38   :  { %s1814_s22 = smov 112   ;;  %s1815_s23 = smov 120   ;;  %vm360_vm3 = vcmask 64512   ;;  %vm383_vm4 = vcmask 58368   ;;  %vm480_vm5 = vcmask 1043456   ;;  %vm452_vm6 = vcmask 326912  }
  0x39   :  { %v2029_v46 = vsub.s32 %v372_v45, %v2026_v44  ;;  %v320_v53 = vunpack.c.0.s8 %v319_v48  ;;  %v2036_v61 = vsub.s32 0, %v2026_v44  ;;  %s1816_s6 = smov 104   ;;  %vm626_vm7 = vcmask 392512   ;;  %s1819_s26 = smov 88  }
  0x3a   :  { %vm797_vm8 = vcmask 458112   ;;  %vm968_vm9 = vcmask 523712   ;;  %s1820_s3 = smov 80   ;;  %vm1050_vm10 = vcmask 254976  }
  0x3b   :  { %v1976_v0 = vld [vmem:[%s2336_s0] sm:$0xff]  ;;  %v1981_v1 = vld [vmem:[%s2336_s0 + $0x8] sm:$0xff]  ;;  %v323_v55 = vsub.s32 %v320_v53, %v2026_v44 }
  0x3c   :  { %v140_v2 = vsel %vm139_vm0, %v1976_v0, 0.0  ;;  %v143_v3 = vsel %vm139_vm0, %v1981_v1, 0.0  ;;  %v1651_v14 = vld [vmem:[%s2337_s30] sm:$0xff]   ;;  %v1652_v16 = vld [vmem:[%s2337_s30 + $0x8] sm:$0xff]  }
  0x3d   :  { %141 = vadd.xlane.f32.xlu0 %v140_v2  ;;  %1558 = vmatpush3.bf16.msra.mxu0 %v1651_v14  ;;  %v1489_v24 = vld [vmem:[%s2338_s24] ss:$0 sm:$0xff]  ;;  %v1654_v38 = vld [vmem:[%s2340_s28 + $0x8] sm:$0xff]  }
  0x3e   :  { %1559 = vmatprep.subr.bf16.mxu0 %v1811_v15  ;;  %v1490_v28 = vld [vmem:[%s2339_s2] ss:$0 sm:$0xff]  ;;  %s1818_s2 = smov 96  }
  0x3f   :  { %v1653_v33 = vld [vmem:[%s2340_s28] sm:$0xff]   ;;  %s1821_s28 = smov 72  }
  0x40   :  { %v1496_v54 = vld [vmem:[%s2341_s27] ss:$0 sm:$0xff] }
  0x41   :  { %144 = vadd.xlane.f32.xlu0 %v143_v3  ;;  %1560 = vmatpush3.bf16.msra.mxu0 %v1652_v16 }
  0x42   :  { %1565 = vmatprep.subr.bf16.mxu0 %v1811_v15 }
  0xca   :  { %v142_v4 = vpop.xlane.xlu0 %141 }
  0xcb   :  { %v147_v5 = vmul.f32 0.03125, %v142_v4 }
  0xcd   :  { %v149_v6 = vsub.f32 %v1976_v0, %v147_v5 }
  0xce   :  { %v145_v7 = vpop.xlane.xlu0 %144 }
  0xcf   :  { %v148_v8 = vmul.f32 0.03125, %v145_v7  ;;  %v151_v9 = vmul.f32 %v149_v6, %v149_v6 }
  0xd1   :  { %v150_v10 = vsub.f32 %v1981_v1, %v148_v8  ;;  %v153_v11 = vsel %vm139_vm0, %v151_v9, 0.0 }
  0xd2   :  { %154 = vadd.xlane.f32.xlu1 %v153_v11 }
  0xd3   :  { %v152_v12 = vmul.f32 %v150_v10, %v150_v10 }
  0xd5   :  { %v156_v13 = vsel %vm139_vm0, %v152_v12, 0.0 }
  0xd6   :  { %157 = vadd.xlane.f32.xlu1 %v156_v13 }
 0x15f   :  { %v155_v17 = vpop.xlane.xlu1 %154 }
 0x160   :  { %v159_v18 = vmul.f32 0.03125, %v155_v17 }
 0x162   :  { %v161_v19 = vadd.f32 1e-06, %v159_v18 }
 0x163   :  { %v158_v20 = vpop.xlane.xlu1 %157 }
 0x164   :  { %1667 = vrsqrt.f32 %v161_v19  ;;  %v160_v21 = vmul.f32 0.03125, %v158_v20 }
 0x166   :  { %v162_v22 = vadd.f32 1e-06, %v160_v21 }
 0x168   :  { %1669 = vrsqrt.f32 %v162_v22 }
 0x16e   :  { %v1668_v23 = vpop.eup %1667 }
 0x16f   :  { %v165_v25 = vmul.f32 %v1668_v23, %v149_v6 }
 0x171   :  { %v173_v26 = vmul.f32 %v1489_v24, %v165_v25 }
 0x172   :  { %v1670_v27 = vpop.eup %1669 }
 0x173   :  { %v166_v29 = vmul.f32 %v1670_v27, %v150_v10  ;;  %v181_v31 = vadd.f32 %v1490_v28, %v173_v26 }
 0x175   :  { %v174_v30 = vmul.f32 %v1489_v24, %v166_v29  ;;  %v183_v34 = vpack.c.bf16 %v181_v31, %v181_v31 }
 0x177   :  { %v182_v32 = vadd.f32 %v1490_v28, %v174_v30  ;;  %v193_v39 = vunpack.c.l.b16 %v183_v34  ;;  %v1817_v34 = vmov 0  }
 0x178   :  { %1650 = vset.pattern.permute.xlu1 %v1817_v34  ;;  %1649 = vset.pattern.permute.xlu0 %v1817_v34 }
 0x179   :  { %v184_v35 = vpack.c.bf16 %v182_v32, %v182_v32  ;;  %v1527_v36 = vpack.c.bf16 %v182_v32, %v181_v31 }
 0x17b   :  { %v194_v37 = vunpack.c.l.b16 %v184_v35  ;;  %1562 = vmatmul.mubr.msk.bf16.vlgmr.msra.gmra.mrb[0].mxu0 %vm139_vm0, %v1527_v36 }
 0x17c   :  { %1566 = vmatpush3.bf16.msra.mxu0 %v1653_v33  ;;  %1569 = vmatprep.mubr.msk.bf16.mxu0 %vm1812_vm1, %v1811_v15 }
 0x17d   :  { %v258_v40 = vrot.slane %v194_v37, 7  ;;  %1567 = vmatprep.subr.bf16.mxu0 %v1811_v15 }
 0x17f   :  { %v260_v41 = vsel %vm259_vm2, %v258_v40, %v193_v39 }
 0x180   :  { %1568 = vmatpush3.bf16.msra.mxu0 %v1654_v38  ;;  %v261_v42 = vpack.c.b16 %v260_v41, %v260_v41 }
 0x181   :  { %1573 = vmatprep.subr.bf16.mxu0 %v1811_v15 }
 0x183   :  { %1570 = vmatmul.mubr.msk.bf16.vlgmr.msra.gmra.mrb[4].mxu0 %vm139_vm0, %v261_v42 }
 0x184   :  { %1575 = vmatprep.mubr.msk.bf16.mxu0 %vm1812_vm1, %v1811_v15 }
 0x24e   :  { %v245_v49 = vpop.f32.mrb[0].mxu0 }
 0x24f   :  { %v1563_v50 = vpop.f32.mrb[1].mxu0  ;;  %v2041_v4 = vadd.f32 %v1491_v63, %v245_v49 }
 0x250   :  { %v248_v51 = vpop.f32.mrb[2].mxu0 }
 0x251   :  { %v1564_v52 = vpop.f32.mrb[3].mxu0  ;;  %v2046_v9 = vadd.f32 %v1491_v63, %v248_v51 }
 0x256   :  { %v311_v56 = vpop.f32.mrb[4].mxu0 }
 0x257   :  { %v312_v57 = vadd.f32 %v1496_v54, %v311_v56  ;;  %v1571_v58 = vpop.f32.mrb[5].mxu0 }
 0x258   :  { %v314_v59 = vpop.f32.mrb[6].mxu0 }
 0x259   :  { %v324_v60 = vrot.slane %v312_v57, %v323_v55  ;;  %v1572_v62 = vpop.f32.mrb[7].mxu0 }
 0x25a   :  { %v2074_v62 = vsub.s32 1, %v2026_v44 }
 0x25b   :  { %v325_v2 = vcombine.high %v324_v60, %v324_v60  ;;  %v332_v3 = vrot.slane %v324_v60, %v323_v55 }
 0x25d   :  { %v339_v5 = vrot.slane %v325_v2, %v323_v55  ;;  %v343_v6 = vrot.slane %v332_v3, %v2036_v61 }
 0x25f   :  { %v347_v7 = vrot.slane %v339_v5, %v2036_v61  ;;  %v350_v8 = vmul.f32 %v343_v6, %v2041_v4 }
 0x261   :  { %703 = vrot.lane.b32.xlu1 %v350_v8, %s1814_s22  ;;  %532 = vrot.lane.b32.xlu0 %v350_v8, %s1815_s23  ;;  %v351_v10 = vmul.f32 %v347_v7, %v2046_v9  ;;  %v361_v11 = vsel %vm360_vm3, %v350_v8, 0.0 }
 0x263   :  { %v364_v12 = vsel %vm360_vm3, %v351_v10, 0.0 }
 0x265   :  { %874 = vrot.lane.b32.xlu0 %v350_v8, %s1816_s6  ;;  %534 = vrot.lane.b32.xlu1 %v351_v10, %s1815_s23 }
 0x269   :  { %705 = vrot.lane.b32.xlu1 %v351_v10, %s1814_s22 }
 0x26d   :  { %876 = vrot.lane.b32.xlu1 %v351_v10, %s1816_s6 }
 0x284   :  { %362 = vadd.xlane.f32.xlu0 %v361_v11 }
 0x291   :  { %365 = vadd.xlane.f32.xlu1 %v364_v12 }
 0x2d3   :  { %v704_v13 = vpop.permute.xlu1 %703  ;;  %v533_v14 = vpop.permute.xlu0 %532 }
 0x2d4   :  { %v538_v16 = vsel %vm360_vm3, %v533_v14, 0.0  ;;  %v709_v20 = vsel %vm360_vm3, %v704_v13, 0.0 }
 0x2d5   :  { %539 = vadd.xlane.f32.xlu0 %v538_v16 }
 0x2d7   :  { %v535_v17 = vpop.permute.xlu1 %534  ;;  %v875_v22 = vpop.permute.xlu0 %874 }
 0x2d8   :  { %v541_v18 = vsel %vm360_vm3, %v535_v17, 0.0  ;;  %v880_v24 = vsel %vm360_vm3, %v875_v22, 0.0 }
 0x2d9   :  { %542 = vadd.xlane.f32.xlu0 %v541_v18 }
 0x2db   :  { %v706_v19 = vpop.permute.xlu1 %705 }
 0x2dc   :  { %v712_v21 = vsel %vm360_vm3, %v706_v19, 0.0 }
 0x2dd   :  { %710 = vadd.xlane.f32.xlu0 %v709_v20  ;;  %713 = vadd.xlane.f32.xlu1 %v712_v21 }
 0x2df   :  { %v877_v23 = vpop.permute.xlu1 %876 }
 0x2e0   :  { %v883_v25 = vsel %vm360_vm3, %v877_v23, 0.0 }
 0x2e1   :  { %881 = vadd.xlane.f32.xlu0 %v880_v24  ;;  %884 = vadd.xlane.f32.xlu1 %v883_v25 }
 0x311   :  { %v363_v26 = vpop.xlane.xlu0 %362 }
 0x312   :  { %v367_v27 = vmul.f32 0.35355338, %v363_v26 }
 0x314   :  { %v376_v30 = vrot.slane %v367_v27, %v2029_v46 }
 0x31e   :  { %v366_v28 = vpop.xlane.xlu1 %365 }
 0x31f   :  { %v368_v29 = vmul.f32 0.35355338, %v366_v28 }
 0x321   :  { %v380_v31 = vrot.slane %v368_v29, %v2029_v46 }
 0x323   :  { %v381_v32 = vsel %vm259_vm2, %v380_v31, %v376_v30 }
 0x324   :  { %v384_v33 = vsel %vm383_vm4, %v381_v32, -inf }
 0x325   :  { %385 = vmax.xlane.f32.xlu0 %v384_v33 }
 0x362   :  { %v540_v35 = vpop.xlane.xlu0 %539 }
 0x363   :  { %v544_v36 = vmul.f32 0.35355338, %v540_v35 }
 0x365   :  { %v551_v39 = vrot.slane %v544_v36, %v2029_v46 }
 0x366   :  { %v543_v37 = vpop.xlane.xlu0 %542 }
 0x367   :  { %v545_v38 = vmul.f32 0.35355338, %v543_v37 }
 0x369   :  { %v555_v40 = vrot.slane %v545_v38, %v2029_v46 }
 0x36a   :  { %v711_v41 = vpop.xlane.xlu0 %710  ;;  %v714_v42 = vpop.xlane.xlu1 %713 }
 0x36b   :  { %v715_v43 = vmul.f32 0.35355338, %v711_v41  ;;  %v716_v45 = vmul.f32 0.35355338, %v714_v42  ;;  %v556_v47 = vsel %vm259_vm2, %v555_v40, %v551_v39 }
 0x36c   :  { %v558_v48 = vsel %vm383_vm4, %v556_v47, -inf }
 0x36d   :  { %v722_v49 = vrot.slane %v715_v43, %v2029_v46  ;;  %v726_v50 = vrot.slane %v716_v45, %v2029_v46  ;;  %559 = vmax.xlane.f32.xlu1 %v558_v48 }
 0x36e   :  { %v882_v51 = vpop.xlane.xlu0 %881  ;;  %v885_v52 = vpop.xlane.xlu1 %884 }
 0x36f   :  { %v886_v53 = vmul.f32 0.35355338, %v882_v51  ;;  %v887_v54 = vmul.f32 0.35355338, %v885_v52  ;;  %v727_v55 = vsel %vm259_vm2, %v726_v50, %v722_v49 }
 0x370   :  { %v729_v56 = vsel %vm383_vm4, %v727_v55, -inf }
 0x371   :  { %v893_v57 = vrot.slane %v886_v53, %v2029_v46  ;;  %v897_v58 = vrot.slane %v887_v54, %v2029_v46  ;;  %730 = vmax.xlane.f32.xlu0 %v729_v56 }
 0x373   :  { %v898_v59 = vsel %vm259_vm2, %v897_v58, %v893_v57 }
 0x374   :  { %v900_v60 = vsel %vm383_vm4, %v898_v59, -inf }
 0x375   :  { %901 = vmax.xlane.f32.xlu1 %v900_v60 }
 0x3b2   :  { %v386_v63 = vpop.xlane.xlu0 %385 }
 0x3b3   :  { %v391_v2 = vrot.slane %v386_v63, %v2036_v61  ;;  %v395_v3 = vrot.slane %v386_v63, %v2074_v62 }
 0x3b5   :  { %v398_v5 = vsub.f32 %v367_v27, %v391_v2  ;;  %v399_v6 = vsub.f32 %v368_v29, %v395_v3 }
 0x3b7   :  { %v400_v7 = vmul.f32 1.442695, %v398_v5  ;;  %v402_v8 = vmul.f32 1.442695, %v399_v6 }
 0x3b9   :  { %1671 = vpow2.f32 %v400_v7 }
 0x3ba   :  { %1673 = vpow2.f32 %v402_v8 }
 0x3c3   :  { %v2078_v10 = vpop.eup %1671 }
 0x3c4   :  { %v2080_v11 = vpop.eup %1673  ;;  %407 = vperm.xlu0 %1649, %v2078_v10  }
 0x3c5   :  { %410 = vperm.xlu1 %1650, %v2080_v11  }
 0x3fa   :  { %v560_v44 = vpop.xlane.xlu1 %559 }
 0x3fb   :  { %v565_v12 = vrot.slane %v560_v44, %v2036_v61  ;;  %v569_v13 = vrot.slane %v560_v44, %v2074_v62 }
 0x3fd   :  { %v572_v14 = vsub.f32 %v544_v36, %v565_v12  ;;  %v573_v16 = vsub.f32 %v545_v38, %v569_v13 }
 0x3fe   :  { %v731_v17 = vpop.xlane.xlu0 %730 }
 0x3ff   :  { %v574_v18 = vmul.f32 1.442695, %v572_v14  ;;  %v736_v19 = vrot.slane %v731_v17, %v2036_v61  ;;  %v576_v20 = vmul.f32 1.442695, %v573_v16  ;;  %v740_v21 = vrot.slane %v731_v17, %v2074_v62 }
 0x401   :  { %1675 = vpow2.f32 %v574_v18  ;;  %v743_v22 = vsub.f32 %v715_v43, %v736_v19  ;;  %v744_v24 = vsub.f32 %v716_v45, %v740_v21 }
 0x402   :  { %v902_v23 = vpop.xlane.xlu1 %901  ;;  %1677 = vpow2.f32 %v576_v20 }
 0x403   :  { %v745_v25 = vmul.f32 1.442695, %v743_v22  ;;  %v907_v26 = vrot.slane %v902_v23, %v2036_v61  ;;  %v747_v27 = vmul.f32 1.442695, %v744_v24  ;;  %v911_v28 = vrot.slane %v902_v23, %v2074_v62 }
 0x405   :  { %1679 = vpow2.f32 %v745_v25  ;;  %v914_v29 = vsub.f32 %v886_v53, %v907_v26  ;;  %v915_v31 = vsub.f32 %v887_v54, %v911_v28 }
 0x406   :  { %1681 = vpow2.f32 %v747_v27 }
 0x407   :  { %v916_v32 = vmul.f32 1.442695, %v914_v29  ;;  %v918_v34 = vmul.f32 1.442695, %v915_v31 }
 0x409   :  { %1683 = vpow2.f32 %v916_v32 }
 0x40a   :  { %1685 = vpow2.f32 %v918_v34 }
 0x40b   :  { %v2090_v30 = vpop.eup %1675 }
 0x40c   :  { %581 = vperm.xlu1 %1650, %v2090_v30   ;;  %v2093_v33 = vpop.eup %1677 }
 0x40f   :  { %v2096_v35 = vpop.eup %1679 }
 0x410   :  { %584 = vperm.xlu1 %1650, %v2093_v33   ;;  %v2099_v36 = vpop.eup %1681 }
 0x413   :  { %v2102_v37 = vpop.eup %1683 }
 0x414   :  { %752 = vperm.xlu1 %1650, %v2096_v35   ;;  %v2105_v38 = vpop.eup %1685 }
 0x418   :  { %755 = vperm.xlu1 %1650, %v2099_v36  }
 0x41c   :  { %923 = vperm.xlu1 %1650, %v2102_v37  }
 0x420   :  { %926 = vperm.xlu1 %1650, %v2105_v38  }
 0x443   :  { %v408_v39 = vpop.permute.xlu0 %407 }
 0x444   :  { %v415_v40 = vrot.slane %v408_v39, %v2029_v46  ;;  %v411_v41 = vpop.permute.xlu1 %410 }
 0x445   :  { %v419_v42 = vrot.slane %v411_v41, %v2029_v46 }
 0x447   :  { %v420_v43 = vsel %vm259_vm2, %v419_v42, %v415_v40 }
 0x448   :  { %v422_v45 = vsel %vm383_vm4, %v420_v43, 0.0 }
 0x449   :  { %423 = vadd.xlane.f32.xlu1 %v422_v45 }
 0x48b   :  { %v582_v47 = vpop.permute.xlu1 %581 }
 0x48c   :  { %v589_v49 = vrot.slane %v582_v47, %v2029_v46 }
 0x48f   :  { %v585_v48 = vpop.permute.xlu1 %584 }
 0x490   :  { %v593_v50 = vrot.slane %v585_v48, %v2029_v46 }
 0x492   :  { %v594_v51 = vsel %vm259_vm2, %v593_v50, %v589_v49  ;;  %v107_v50 = vld [vmem:[%s2312_s7 + $0x4] sm:$0xf] }
 0x493   :  { %v753_v52 = vpop.permute.xlu1 %752  ;;  %v596_v53 = vsel %vm383_vm4, %v594_v51, 0.0 }
 0x494   :  { %597 = vadd.xlane.f32.xlu0 %v596_v53  ;;  %v760_v55 = vrot.slane %v753_v52, %v2029_v46  ;;  %v655_v52 = vsel %vm480_vm5, %v107_v50, 0 }
 0x495   :  { %1580 = vmatpush3.bf16.msra.mxu1 %v655_v52 }
 0x496   :  { %1591 = vmatprep.subr.bf16.mxu1 %v1811_v15 }
 0x497   :  { %v756_v54 = vpop.permute.xlu1 %755 }
 0x498   :  { %v764_v56 = vrot.slane %v756_v54, %v2029_v46 }
 0x49a   :  { %v765_v57 = vsel %vm259_vm2, %v764_v56, %v760_v55 }
 0x49b   :  { %v924_v58 = vpop.permute.xlu1 %923  ;;  %v767_v59 = vsel %vm383_vm4, %v765_v57, 0.0 }
 0x49c   :  { %768 = vadd.xlane.f32.xlu0 %v767_v59  ;;  %v931_v63 = vrot.slane %v924_v58, %v2029_v46 }
 0x49f   :  { %v927_v60 = vpop.permute.xlu1 %926 }
 0x4a0   :  { %v935_v2 = vrot.slane %v927_v60, %v2029_v46 }
 0x4a2   :  { %v936_v3 = vsel %vm259_vm2, %v935_v2, %v931_v63 }
 0x4a3   :  { %v938_v5 = vsel %vm383_vm4, %v936_v3, 0.0 }
 0x4a4   :  { %939 = vadd.xlane.f32.xlu1 %v938_v5 }
 0x4d6   :  { %v424_v6 = vpop.xlane.xlu1 %423 }
 0x4d7   :  { %v429_v7 = vrot.slane %v424_v6, %v2036_v61  ;;  %v433_v8 = vrot.slane %v424_v6, %v2074_v62 }
 0x4d9   :  { %1687 = vrcp.f32 %v429_v7 }
 0x4da   :  { %1689 = vrcp.f32 %v433_v8 }
 0x4e3   :  { %v1688_v44 = vpop.eup %1687 }
 0x4e4   :  { %v1690_v12 = vpop.eup %1689  ;;  %v437_v13 = vmul.f32 %v1688_v44, %v2078_v10 }
 0x4e5   :  { %v439_v14 = vmul.f32 %v1690_v12, %v2080_v11 }
 0x4e6   :  { %442 = vperm.xlu0 %1649, %v437_v13  }
 0x4e7   :  { %447 = vperm.xlu1 %1650, %v439_v14  }
 0x521   :  { %v598_v46 = vpop.xlane.xlu0 %597 }
 0x522   :  { %v603_v16 = vrot.slane %v598_v46, %v2036_v61  ;;  %v607_v17 = vrot.slane %v598_v46, %v2074_v62 }
 0x524   :  { %1691 = vrcp.f32 %v603_v16 }
 0x525   :  { %1693 = vrcp.f32 %v607_v17 }
 0x529   :  { %v769_v18 = vpop.xlane.xlu0 %768 }
 0x52a   :  { %v774_v19 = vrot.slane %v769_v18, %v2036_v61  ;;  %v778_v20 = vrot.slane %v769_v18, %v2074_v62 }
 0x52c   :  { %1695 = vrcp.f32 %v774_v19 }
 0x52d   :  { %1697 = vrcp.f32 %v778_v20 }
 0x52e   :  { %v1692_v21 = vpop.eup %1691 }
 0x52f   :  { %v1694_v10 = vpop.eup %1693  ;;  %v611_v11 = vmul.f32 %v1692_v21, %v2090_v30 }
 0x530   :  { %v613_v22 = vmul.f32 %v1694_v10, %v2093_v33 }
 0x531   :  { %616 = vperm.xlu1 %1650, %v611_v11   ;;  %v940_v23 = vpop.xlane.xlu1 %939 }
 0x532   :  { %621 = vperm.xlu0 %1649, %v613_v22   ;;  %v945_v24 = vrot.slane %v940_v23, %v2036_v61  ;;  %v949_v25 = vrot.slane %v940_v23, %v2074_v62  ;;  %v106_v61 = vld [vmem:[%s2312_s7] sm:$0xf] }
 0x533   :  { %v482_v62 = vsel %vm480_vm5, %v106_v61, 0 }
 0x534   :  { %1699 = vrcp.f32 %v945_v24  ;;  %1574 = vmatpush3.bf16.msra.mxu0 %v482_v62 }
 0x535   :  { %1701 = vrcp.f32 %v949_v25  ;;  %1585 = vmatprep.subr.bf16.mxu0 %v1811_v15 }
 0x536   :  { %v1696_v26 = vpop.eup %1695 }
 0x537   :  { %v1698_v27 = vpop.eup %1697  ;;  %v782_v28 = vmul.f32 %v1696_v26, %v2096_v35 }
 0x538   :  { %v784_v29 = vmul.f32 %v1698_v27, %v2099_v36 }
 0x539   :  { %787 = vperm.xlu1 %1650, %v782_v28  }
 0x53a   :  { %792 = vperm.xlu0 %1649, %v784_v29  }
 0x53e   :  { %v1700_v30 = vpop.eup %1699 }
 0x53f   :  { %v1702_v31 = vpop.eup %1701  ;;  %v953_v32 = vmul.f32 %v1700_v30, %v2102_v37 }
 0x540   :  { %v955_v33 = vmul.f32 %v1702_v31, %v2105_v38 }
 0x541   :  { %958 = vperm.xlu1 %1650, %v953_v32  }
 0x542   :  { %963 = vperm.xlu0 %1649, %v955_v33  }
 0x565   :  { %v443_v34 = vpop.permute.xlu0 %442 }
 0x566   :  { %v450_v35 = vmul.f32 %v443_v34, %v2041_v4  ;;  %v448_v36 = vpop.permute.xlu1 %447 }
 0x567   :  { %v451_v37 = vmul.f32 %v448_v36, %v2046_v9 }
 0x568   :  { %v453_v38 = vsel %vm452_vm6, %v450_v35, 0.0 }
 0x569   :  { %v454_v39 = vrot.slane %v453_v38, 4  ;;  %v460_v40 = vsel %vm452_vm6, %v451_v37, 0.0 }
 0x56a   :  { %v461_v41 = vrot.slane %v460_v40, 4 }
 0x56b   :  { %v455_v42 = vadd.f32 %v454_v39, %v453_v38 }
 0x56c   :  { %v462_v43 = vadd.f32 %v461_v41, %v460_v40 }
 0x56d   :  { %v456_v45 = vrot.slane %v455_v42, 2 }
 0x56e   :  { %v463_v47 = vrot.slane %v462_v43, 2 }
 0x56f   :  { %v457_v48 = vadd.f32 %v456_v45, %v455_v42 }
 0x570   :  { %v464_v49 = vadd.f32 %v463_v47, %v462_v43 }
 0x571   :  { %v458_v51 = vrot.slane %v457_v48, 1 }
 0x572   :  { %v465_v53 = vrot.slane %v464_v49, 1 }
 0x573   :  { %v459_v54 = vadd.f32 %v458_v51, %v457_v48 }
 0x574   :  { %v466_v55 = vadd.f32 %v465_v53, %v464_v49 }
 0x575   :  { %v467_v56 = vpack.c.bf16 %v459_v54, %v459_v54 }
 0x576   :  { %v468_v57 = vpack.c.bf16 %v466_v55, %v466_v55 }
 0x577   :  { %v471_v58 = vunpack.c.l.b16 %v467_v56 }
 0x578   :  { %v472_v59 = vunpack.c.l.b16 %v468_v57 }
 0x57a   :  { %v473_v60 = vsel %vm259_vm2, %v472_v59, %v471_v58 }
 0x57b   :  { %v474_v63 = vpack.c.b16 %v473_v60, %v473_v60 }
 0x57d   :  { %475 = vrot.lane.b32.xlu1 %v474_v63, %s1818_s2 }
 0x5b0   :  { %v617_v2 = vpop.permute.xlu1 %616 }
 0x5b1   :  { %v622_v3 = vpop.permute.xlu0 %621  ;;  %v624_v5 = vmul.f32 %v617_v2, %v2041_v4 }
 0x5b2   :  { %v625_v6 = vmul.f32 %v622_v3, %v2046_v9 }
 0x5b3   :  { %v627_v7 = vsel %vm626_vm7, %v624_v5, 0.0 }
 0x5b4   :  { %v634_v8 = vsel %vm626_vm7, %v625_v6, 0.0  ;;  %v628_v44 = vrot.slane %v627_v7, 4 }
 0x5b5   :  { %v635_v12 = vrot.slane %v634_v8, 4 }
 0x5b6   :  { %v629_v13 = vadd.f32 %v628_v44, %v627_v7 }
 0x5b7   :  { %v636_v14 = vadd.f32 %v635_v12, %v634_v8 }
 0x5b8   :  { %v630_v46 = vrot.slane %v629_v13, 2  ;;  %v788_v16 = vpop.permute.xlu1 %787 }
 0x5b9   :  { %v637_v17 = vrot.slane %v636_v14, 2  ;;  %v793_v18 = vpop.permute.xlu0 %792  ;;  %v795_v19 = vmul.f32 %v788_v16, %v2041_v4  ;;  %v108_v16 = vld [vmem:[%s2312_s7 + $0x8] sm:$0xf] }
 0x5ba   :  { %v631_v20 = vadd.f32 %v630_v46, %v629_v13  ;;  %v796_v21 = vmul.f32 %v793_v18, %v2046_v9 }
 0x5bb   :  { %v638_v10 = vadd.f32 %v637_v17, %v636_v14  ;;  %v798_v11 = vsel %vm797_vm8, %v795_v19, 0.0  ;;  %v826_v17 = vsel %vm480_vm5, %v108_v16, 0  ;;  %v109_v19 = vld [vmem:[%s2312_s7 + $0xc] sm:$0xf] }
 0x5bc   :  { %v632_v22 = vrot.slane %v631_v20, 1  ;;  %v805_v23 = vsel %vm797_vm8, %v796_v21, 0.0  ;;  %v799_v24 = vrot.slane %v798_v11, 4 }
 0x5bd   :  { %v639_v25 = vrot.slane %v638_v10, 1  ;;  %v806_v26 = vrot.slane %v805_v23, 4 }
 0x5be   :  { %v633_v27 = vadd.f32 %v632_v22, %v631_v20  ;;  %v800_v28 = vadd.f32 %v799_v24, %v798_v11  ;;  %v997_v20 = vsel %vm480_vm5, %v109_v19, 0 }
 0x5bf   :  { %v640_v29 = vadd.f32 %v639_v25, %v638_v10  ;;  %v807_v30 = vadd.f32 %v806_v26, %v805_v23  ;;  %v1500_v26 = vld [vmem:[%s2313_s8] ss:$0 sm:$0xff] }
 0x5c0   :  { %v641_v31 = vpack.c.bf16 %v633_v27, %v633_v27  ;;  %v801_v32 = vrot.slane %v800_v28, 2  ;;  %v959_v33 = vpop.permute.xlu1 %958  ;;  %v358_v27 = vadd.f32 %v1500_v26, %v1976_v0 }
 0x5c1   :  { %v642_v61 = vpack.c.bf16 %v640_v29, %v640_v29  ;;  %v808_v62 = vrot.slane %v807_v30, 2  ;;  %v964_v34 = vpop.permute.xlu0 %963  ;;  %v966_v35 = vmul.f32 %v959_v33, %v2041_v4 }
 0x5c2   :  { %v645_v36 = vunpack.c.l.b16 %v641_v31  ;;  %v802_v37 = vadd.f32 %v801_v32, %v800_v28  ;;  %v967_v38 = vmul.f32 %v964_v34, %v2046_v9  ;;  %v359_v28 = vadd.f32 %v1500_v26, %v1981_v1  ;;  %v1658_v26 = vld [vmem:[%s2318_s13 + $0x8] sm:$0xff]  }
 0x5c3   :  { %v646_v39 = vunpack.c.l.b16 %v642_v61  ;;  %v809_v40 = vadd.f32 %v808_v62, %v807_v30  ;;  %v969_v41 = vsel %vm968_vm9, %v966_v35, 0.0 }
 0x5c4   :  { %v803_v42 = vrot.slane %v802_v37, 1  ;;  %v976_v43 = vsel %vm968_vm9, %v967_v38, 0.0  ;;  %v970_v45 = vrot.slane %v969_v41, 4 }
 0x5c5   :  { %v810_v47 = vrot.slane %v809_v40, 1  ;;  %v977_v48 = vrot.slane %v976_v43, 4  ;;  %v647_v49 = vsel %vm259_vm2, %v646_v39, %v645_v36 }
 0x5c6   :  { %v804_v50 = vadd.f32 %v803_v42, %v802_v37  ;;  %v971_v51 = vadd.f32 %v970_v45, %v969_v41  ;;  %v648_v52 = vpack.c.b16 %v647_v49, %v647_v49 }
 0x5c7   :  { %v811_v53 = vadd.f32 %v810_v47, %v809_v40  ;;  %v978_v54 = vadd.f32 %v977_v48, %v976_v43 }
 0x5c8   :  { %v812_v4 = vpack.c.bf16 %v804_v50, %v804_v50  ;;  %v972_v55 = vrot.slane %v971_v51, 2  ;;  %649 = vrot.lane.b32.xlu0 %v648_v52, %s1819_s26 }
 0x5c9   :  { %v813_v9 = vpack.c.bf16 %v811_v53, %v811_v53  ;;  %v979_v56 = vrot.slane %v978_v54, 2 }
 0x5ca   :  { %v816_v57 = vunpack.c.l.b16 %v812_v4  ;;  %v973_v58 = vadd.f32 %v972_v55, %v971_v51 }
 0x5cb   :  { %v817_v59 = vunpack.c.l.b16 %v813_v9  ;;  %v980_v60 = vadd.f32 %v979_v56, %v978_v54 }
 0x5cc   :  { %v974_v63 = vrot.slane %v973_v58, 1 }
 0x5cd   :  { %v981_v2 = vrot.slane %v980_v60, 1  ;;  %v818_v3 = vsel %vm259_vm2, %v817_v59, %v816_v57 }
 0x5ce   :  { %v975_v5 = vadd.f32 %v974_v63, %v973_v58  ;;  %v819_v6 = vpack.c.b16 %v818_v3, %v818_v3  ;;  %v1656_v3 = vld [vmem:[%s2316_s11 + $0x8] sm:$0xff]  }
 0x5cf   :  { %v982_v7 = vadd.f32 %v981_v2, %v980_v60  ;;  %v1655_v2 = vld [vmem:[%s2316_s11] sm:$0xff]  }
 0x5d0   :  { %v983_v8 = vpack.c.bf16 %v975_v5, %v975_v5  ;;  %820 = vrot.lane.b32.xlu1 %v819_v6, %s1820_s3 }
 0x5d1   :  { %v984_v44 = vpack.c.bf16 %v982_v7, %v982_v7 }
 0x5d2   :  { %v987_v12 = vunpack.c.l.b16 %v983_v8 }
 0x5d3   :  { %v988_v13 = vunpack.c.l.b16 %v984_v44  ;;  %v1505_v44 = vld [vmem:[%s2314_s9] ss:$0 sm:$0xff] }
 0x5d5   :  { %v989_v14 = vsel %vm259_vm2, %v988_v13, %v987_v12 }
 0x5d6   :  { %v990_v46 = vpack.c.b16 %v989_v14, %v989_v14  ;;  %v1506_v14 = vld [vmem:[%s2315_s10] ss:$0 sm:$0xff]  ;;  %s1823_s10 = smov [#allocation8]  }
 0x5d7   :  { %s1465_s11 = sshll.u32 %s1823_s10, 4  ;;  %s1466_s11 = int_to_ptr.vmem [resolvable:$true] %s1465_s11 }
 0x5d8   :  { %991 = vrot.lane.b32.xlu0 %v990_v46, %s1821_s28  ;;  %s1757_s12 = scalar_lea.vmem %s1466_s11, 32  ;;  %p1762_p7 = scmp.lt.s32.totalorder %s1466_s11, %s1466_s11 }
 0x5d9   :  { %p1758_p6 = scmp.ne.s32.totalorder %s1466_s11, %s1757_s12  ;;  %p1763_p8 = scmp.lt.s32.totalorder %s1757_s12, %s1757_s12 }
 0x5db   :  { %p1764_p9 = por %p1763_p8, %p1762_p7 }
 0x5dd   :  { %p1765_p10 = pnand %p1764_p9, %p1758_p6 }
 0x5ef   :  { %v476_v18 = vpop.permute.xlu1 %475 }
 0x5f0   :  { %1576 = vmatmul.mubr.msk.bf16.vlgmr.msra.gmra.mrb[8].mxu0 %vm360_vm3, %v476_v18 }
 0x5f1   :  { %1586 = vmatpush3.bf16.msra.mxu0 %v826_v17  ;;  %1587 = vmatprep.mubr.msk.bf16.mxu0 %vm1812_vm1, %v1811_v15 }
 0x5f2   :  { %1597 = vmatprep.subr.bf16.mxu0 %v1811_v15 }
 0x63a   :  { %v650_v21 = vpop.permute.xlu0 %649 }
 0x63b   :  { %1582 = vmatmul.mubr.msk.bf16.vlgmr.msra.gmra.mrb[0].mxu1 %vm360_vm3, %v650_v21 }
 0x63c   :  { %1592 = vmatpush3.bf16.msra.mxu1 %v997_v20  ;;  %1593 = vmatprep.mubr.msk.bf16.mxu1 %vm1812_vm1, %v1811_v15 }
 0x63d   :  { %1605 = vmatprep.subr.bf16.mxu1 %v1811_v15 }
 0x642   :  { %v821_v10 = vpop.permute.xlu1 %820 }
 0x643   :  { %1588 = vmatmul.mubr.msk.bf16.vlgmr.msra.gmra.mrb[12].mxu0 %vm360_vm3, %v821_v10 }
 0x644   :  { %1601 = vmatprep.mubr.msk.bf16.mxu0 %vm1812_vm1, %v1811_v15  ;;  %1598 = vmatpush3.bf16.msra.mxu0 %v1655_v2 }
 0x645   :  { %1599 = vmatprep.subr.bf16.mxu0 %v1811_v15 }
 0x648   :  { %1600 = vmatpush3.bf16.msra.mxu0 %v1656_v3 }
 0x649   :  { %1625 = vmatprep.subr.bf16.mxu0 %v1811_v15 }
 0x64a   :  { %v992_v11 = vpop.permute.xlu0 %991 }
 0x64b   :  { %1594 = vmatmul.mubr.msk.bf16.vlgmr.msra.gmra.mrb[4].mxu1 %vm360_vm3, %v992_v11 }
 0x64c   :  { %1621 = vmatprep.mubr.msk.bf16.mxu1 %vm1812_vm1, %v1811_v15 }
 0x6c3   :  { %v518_v22 = vpop.f32.mrb[8].mxu0 }
 0x6c4   :  { %v1577_v23 = vpop.f32.mrb[9].mxu0  ;;  %v525_v29 = vrot.slane %v518_v22, 1  ;;  %v528_v30 = vadd.f32 %v518_v22, %v358_v27  ;;  %v1659_v27 = vld [vmem:[%s2318_s13 + $0x10] sm:$0xff]  }
 0x6c5   :  { %v521_v24 = vpop.f32.mrb[10].mxu0 }
 0x6c6   :  { %v1578_v25 = vpop.f32.mrb[11].mxu0  ;;  %v529_v32 = vadd.f32 %v525_v29, %v359_v28  ;;  %v1660_v28 = vld [vmem:[%s2318_s13 + $0x18] sm:$0xff]   ;;  %v1661_v29 = vld [vmem:[%s2318_s13 + $0x20] sm:$0xff]  }
 0x6c7   :  { %v1657_v25 = vld [vmem:[%s2318_s13] sm:$0xff]  }
 0x6c8   :  { %1606 = vmatpush3.bf16.msra.mxu1 %v1657_v25 }
 0x6c9   :  { %1607 = vmatprep.subr.bf16.mxu1 %v1811_v15 }
 0x6cc   :  { %1608 = vmatpush3.bf16.msra.mxu1 %v1658_v26  ;;  %v1665_v26 = vld [vmem:[%s2324_s19] sm:$0xff]  }
 0x6cd   :  { %1609 = vmatprep.subr.bf16.mxu1 %v1811_v15 }
 0x6d0   :  { %1610 = vmatpush3.bf16.msra.mxu1 %v1659_v27  ;;  %v1666_v27 = vld [vmem:[%s2324_s19 + $0x8] sm:$0xff]  }
 0x6d1   :  { %1611 = vmatprep.subr.bf16.mxu1 %v1811_v15 }
 0x6d4   :  { %1612 = vmatpush3.bf16.msra.mxu1 %v1660_v28 }
 0x6d5   :  { %1613 = vmatprep.subr.bf16.mxu1 %v1811_v15 }
 0x6d8   :  { %1614 = vmatpush3.bf16.msra.mxu1 %v1661_v29 }
 0x6d9   :  { %1615 = vmatprep.subr.bf16.mxu1 %v1811_v15 }
 0x70e   :  { %v691_v31 = vpop.f32.mrb[0].mxu1 }
 0x70f   :  { %v698_v33 = vrot.slane %v691_v31, 1  ;;  %v701_v61 = vadd.f32 %v691_v31, %v528_v30  ;;  %v1583_v62 = vpop.f32.mrb[1].mxu1  ;;  %v1662_v30 = vld [vmem:[%s2318_s13 + $0x28] sm:$0xff]   ;;  %v1663_v31 = vld [vmem:[%s2318_s13 + $0x30] sm:$0xff]  }
 0x710   :  { %v694_v34 = vpop.f32.mrb[2].mxu1  ;;  %1616 = vmatpush3.bf16.msra.mxu1 %v1662_v30 }
 0x711   :  { %v702_v35 = vadd.f32 %v698_v33, %v529_v32  ;;  %v1584_v36 = vpop.f32.mrb[3].mxu1  ;;  %1617 = vmatprep.subr.bf16.mxu1 %v1811_v15  ;;  %v1664_v32 = vld [vmem:[%s2318_s13 + $0x38] sm:$0xff]   ;;  %v1507_v33 = vld [vmem:[#allocation3] ss:$0 sm:$0xff] }
 0x714   :  { %1618 = vmatpush3.bf16.msra.mxu1 %v1663_v31 }
 0x715   :  { %1619 = vmatprep.subr.bf16.mxu1 %v1811_v15 }
 0x716   :  { %v862_v37 = vpop.f32.mrb[12].mxu0 }
 0x717   :  { %v869_v38 = vrot.slane %v862_v37, 1  ;;  %v872_v39 = vadd.f32 %v862_v37, %v701_v61  ;;  %v1589_v40 = vpop.f32.mrb[13].mxu0 }
 0x718   :  { %v865_v41 = vpop.f32.mrb[14].mxu0  ;;  %1620 = vmatpush3.bf16.msra.mxu1 %v1664_v32 }
 0x719   :  { %v873_v42 = vadd.f32 %v869_v38, %v702_v35  ;;  %v1590_v43 = vpop.f32.mrb[15].mxu0 }
 0x71e   :  { %v1033_v0 = vpop.f32.mrb[4].mxu1 }
 0x71f   :  { %v1040_v45 = vrot.slane %v1033_v0, 1  ;;  %v2189_v1 = vadd.f32 %v1033_v0, %v872_v39  ;;  %v1595_v47 = vpop.f32.mrb[5].mxu1 }
 0x720   :  { %v1036_v48 = vpop.f32.mrb[6].mxu1 }
 0x721   :  { %v2191_v49 = vadd.f32 %v1040_v45, %v873_v42  ;;  %v1596_v50 = vpop.f32.mrb[7].mxu1 }
 0x723   :  { %v1047_v51 = vrot.slane %v2191_v49, 7 }
 0x725   :  { %v1048_v52 = vsel %vm259_vm2, %v1047_v51, %v2189_v1 }
 0x726   :  { %v1051_v53 = vsel %vm1050_vm10, %v1048_v52, 0.0 }
 0x727   :  { %1052 = vadd.xlane.f32.xlu1 %v1051_v53 }
 0x7b4   :  { %v1053_v54 = vpop.xlane.xlu1 %1052 }
 0x7b5   :  { %v1054_v4 = vmul.f32 0.03125, %v1053_v54 }
 0x7b7   :  { %v1056_v55 = vrot.slane %v1054_v4, 1  ;;  %v1059_v9 = vsub.f32 %v2189_v1, %v1054_v4 }
 0x7b9   :  { %v1060_v56 = vsub.f32 %v2191_v49, %v1056_v55  ;;  %v1061_v58 = vmul.f32 %v1059_v9, %v1059_v9 }
 0x7bb   :  { %v1062_v57 = vmul.f32 %v1060_v56, %v1060_v56 }
 0x7bd   :  { %v1065_v59 = vrot.slane %v1062_v57, 7  ;;  %v1822_v57 = vmov 1.0  }
 0x7bf   :  { %v1066_v60 = vsel %vm259_vm2, %v1065_v59, %v1061_v58 }
 0x7c0   :  { %v1068_v63 = vsel %vm1050_vm10, %v1066_v60, 0.0 }
 0x7c1   :  { %1069 = vadd.xlane.f32.xlu0 %v1068_v63 }
 0x84e   :  { %v1070_v5 = vpop.xlane.xlu0 %1069 }
 0x84f   :  { %v1071_v6 = vmul.f32 0.03125, %v1070_v5 }
 0x851   :  { %v1072_v7 = vadd.f32 1e-06, %v1071_v6 }
 0x853   :  { %1703 = vrsqrt.f32 %v1072_v7 }
 0x85d   :  { %v1704_v8 = vpop.eup %1703 }
 0x85e   :  { %v1075_v12 = vrot.slane %v1704_v8, 1  ;;  %v1078_v13 = vmul.f32 %v1704_v8, %v1059_v9 }
 0x860   :  { %v1079_v46 = vmul.f32 %v1075_v12, %v1060_v56  ;;  %v1086_v16 = vmul.f32 %v1505_v44, %v1078_v13 }
 0x862   :  { %v1087_v17 = vmul.f32 %v1505_v44, %v1079_v46  ;;  %v1094_v18 = vadd.f32 %v1506_v14, %v1086_v16 }
 0x864   :  { %v1095_v19 = vadd.f32 %v1506_v14, %v1087_v17  ;;  %v1096_v20 = vpack.c.bf16 %v1094_v18, %v1094_v18  ;;  %v1519_v14 = vld [vmem:[#allocation6] ss:$0 sm:$0xff] }
 0x866   :  { %v1097_v21 = vpack.c.bf16 %v1095_v19, %v1095_v19  ;;  %v1106_v11 = vunpack.c.l.b16 %v1096_v20 }
 0x868   :  { %v1107_v10 = vunpack.c.l.b16 %v1097_v21 }
 0x86a   :  { %v1108_v22 = vrot.slane %v1107_v10, 7 }
 0x86c   :  { %v1109_v23 = vsel %vm259_vm2, %v1108_v22, %v1106_v11 }
 0x86d   :  { %v1110_v24 = vpack.c.b16 %v1109_v23, %v1109_v23 }
 0x86f   :  { %1602 = vmatmul.mubr.msk.bf16.vlgmr.msra.gmra.mrb[16].mxu0 %vm139_vm0, %v1110_v24 }
 0x870   :  { %1629 = vmatprep.mubr.msk.bf16.mxu0 %vm1812_vm1, %v1811_v15  ;;  %1626 = vmatpush3.bf16.msra.mxu0 %v1665_v26 }
 0x871   :  { %1627 = vmatprep.subr.bf16.mxu0 %v1811_v15 }
 0x874   :  { %1628 = vmatpush3.bf16.msra.mxu0 %v1666_v27 }
 0x942   :  { %v1160_v61 = vpop.f32.mrb[16].mxu0 }
 0x943   :  { %v1161_v62 = vadd.f32 %v1507_v33, %v1160_v61  ;;  %v1603_v34 = vpop.f32.mrb[17].mxu0  ;;  %v1520_v61 = vld [vmem:[%s2320_s15] ss:$0 sm:$0xff] }
 0x944   :  { %v1163_v35 = vpop.f32.mrb[18].mxu0 }
 0x945   :  { %v1167_v36 = vmul.f32 0.70710677, %v1161_v62  ;;  %v1604_v37 = vpop.f32.mrb[19].mxu0  ;;  %v1166_v60 = vmul.f32 0.5, %v1161_v62 }
 0x947   :  { %v1170_v38 = vand.u32 2147483647, %v1167_v36  ;;  %vm1168_vm11 = vcmp.lt.f32.partialorder %v1167_v36, 0.0  ;;  %v1521_v36 = vld [vmem:[%s2321_s16] ss:$0 sm:$0xff] }
 0x948   :  { %v1169_v58 = vsel %vm1168_vm11, -1.0, %v1822_v57 }
 0x949   :  { %v1171_v39 = vmul.f32 0.3275911, %v1170_v38  ;;  %v1184_v41 = vsub.f32 0.0, %v1170_v38 }
 0x94b   :  { %v1172_v40 = vadd.f32 1.0, %v1171_v39  ;;  %v1185_v43 = vmul.f32 %v1184_v41, %v1170_v38 }
 0x94d   :  { %1705 = vrcp.f32 %v1172_v40  ;;  %v1186_v47 = vmul.f32 1.442695, %v1185_v43 }
 0x94f   :  { %1707 = vpow2.f32 %v1186_v47 }
 0x957   :  { %v1706_v42 = vpop.eup %1705 }
 0x958   :  { %v1175_v0 = vmul.f32 1.0614054, %v1706_v42 }
 0x959   :  { %v1708_v55 = vpop.eup %1707 }
 0x95a   :  { %v1176_v45 = vadd.f32 -1.4531521, %v1175_v0 }
 0x95c   :  { %v1177_v48 = vmul.f32 %v1706_v42, %v1176_v45 }
 0x95e   :  { %v1178_v50 = vadd.f32 1.4214138, %v1177_v48 }
 0x960   :  { %v1179_v51 = vmul.f32 %v1706_v42, %v1178_v50 }
 0x962   :  { %v1180_v52 = vadd.f32 -0.28449672, %v1179_v51 }
 0x964   :  { %v1181_v53 = vmul.f32 %v1706_v42, %v1180_v52 }
 0x966   :  { %v1182_v54 = vadd.f32 0.2548296, %v1181_v53 }
 0x968   :  { %v1183_v4 = vmul.f32 %v1706_v42, %v1182_v54 }
 0x96a   :  { %v1188_v9 = vmul.f32 %v1708_v55, %v1183_v4 }
 0x96c   :  { %v1189_v56 = vsub.f32 1.0, %v1188_v9 }
 0x96e   :  { %v1190_v59 = vmul.f32 %v1189_v56, %v1169_v58 }
 0x970   :  { %v1191_v63 = vadd.f32 1.0, %v1190_v59 }
 0x972   :  { %v1192_v2 = vmul.f32 %v1191_v63, %v1166_v60  ;;  %v1522_v63 = vld [vmem:[%s2322_s17] ss:$0 sm:$0xff] }
 0x974   :  { %v1193_v3 = vpack.c.bf16 %v1192_v2, %v1192_v2 }
 0x976   :  { %1622 = vmatmul.mubr.bf16.vlgmr.msra.gmra.mrb[8].mxu1 %v1193_v3  ;;  %v1523_v3 = vld [vmem:[%s2323_s18] ss:$0 sm:$0xff] }
 0xa49   :  { %v1276_v5 = vpop.f32.mrb[8].mxu1 }
 0xa4a   :  { %v1283_v6 = vrot.slane %v1276_v5, 1  ;;  %v1623_v7 = vpop.f32.mrb[9].mxu1  ;;  %v1286_v44 = vadd.f32 %v1276_v5, %v2189_v1 }
 0xa4b   :  { %v1279_v8 = vpop.f32.mrb[10].mxu1 }
 0xa4c   :  { %v1287_v12 = vadd.f32 %v1283_v6, %v2191_v49  ;;  %v1624_v13 = vpop.f32.mrb[11].mxu1  ;;  %v1294_v16 = vadd.f32 %v1519_v14, %v1286_v44 }
 0xa4e   :  { %v1295_v46 = vadd.f32 %v1519_v14, %v1287_v12 }
 0xa50   :  { %v1298_v17 = vrot.slane %v1295_v46, 7 }
 0xa52   :  { %v1299_v18 = vsel %vm259_vm2, %v1298_v17, %v1294_v16 }
 0xa53   :  { %v1301_v19 = vsel %vm1050_vm10, %v1299_v18, 0.0 }
 0xa54   :  { %1302 = vadd.xlane.f32.xlu0 %v1301_v19 }
 0xae1   :  { %v1303_v20 = vpop.xlane.xlu0 %1302 }
 0xae2   :  { %v1304_v21 = vmul.f32 0.03125, %v1303_v20 }
 0xae4   :  { %v1306_v10 = vrot.slane %v1304_v21, 1  ;;  %v1309_v11 = vsub.f32 %v1294_v16, %v1304_v21 }
 0xae6   :  { %v1310_v22 = vsub.f32 %v1295_v46, %v1306_v10  ;;  %v1311_v24 = vmul.f32 %v1309_v11, %v1309_v11 }
 0xae8   :  { %v1312_v23 = vmul.f32 %v1310_v22, %v1310_v22 }
 0xaea   :  { %v1315_v1 = vrot.slane %v1312_v23, 7 }
 0xaec   :  { %v1316_v49 = vsel %vm259_vm2, %v1315_v1, %v1311_v24 }
 0xaed   :  { %v1318_v25 = vsel %vm1050_vm10, %v1316_v49, 0.0 }
 0xaee   :  { %1319 = vadd.xlane.f32.xlu1 %v1318_v25 }
 0xb7b   :  { %v1320_v28 = vpop.xlane.xlu1 %1319 }
 0xb7c   :  { %v1321_v29 = vmul.f32 0.03125, %v1320_v28 }
 0xb7e   :  { %v1322_v30 = vadd.f32 1e-06, %v1321_v29 }
 0xb80   :  { %1709 = vrsqrt.f32 %v1322_v30 }
 0xb8a   :  { %v1710_v31 = vpop.eup %1709 }
 0xb8b   :  { %v1325_v32 = vrot.slane %v1710_v31, 1  ;;  %v1328_v33 = vmul.f32 %v1710_v31, %v1309_v11 }
 0xb8d   :  { %v1329_v62 = vmul.f32 %v1325_v32, %v1310_v22  ;;  %v1336_v34 = vmul.f32 %v1520_v61, %v1328_v33 }
 0xb8f   :  { %v1337_v35 = vmul.f32 %v1520_v61, %v1329_v62  ;;  %v1344_v37 = vadd.f32 %v1521_v36, %v1336_v34 }
 0xb91   :  { %v1345_v15 = vadd.f32 %v1521_v36, %v1337_v35 }
 0xb93   :  { %v1348_v38 = vrot.slane %v1345_v15, 7 }
 0xb95   :  { %v1349_v39 = vsel %vm259_vm2, %v1348_v38, %v1344_v37 }
 0xb96   :  { %1354 = vst.msk [vmem:[#allocation2] sm:$0x3] %vm1050_vm10, %v1349_v39  ;;  %1351 = vst.msk [vmem:[#allocation8] sm:$0x3] %vm1050_vm10, %v1349_v39 }
 0xb9d   :  { %v1359_v40 = vld [vmem:[#allocation2] sm:$0x3] }
 0xb9e   :  { %v1360_v41 = vsel %vm1050_vm10, %v1359_v40, 0.0 }
 0xb9f   :  { %v1361_v42 = vrot.slane %v1360_v41, 4 }
 0xba1   :  { %v1362_v43 = vadd.f32 %v1361_v42, %v1360_v41 }
 0xba3   :  { %v1363_v0 = vrot.slane %v1362_v43, 2 }
 0xba5   :  { %v1364_v45 = vadd.f32 %v1363_v0, %v1362_v43 }
 0xba7   :  { %v1365_v47 = vrot.slane %v1364_v45, 1 }
 0xba9   :  { %v1366_v48 = vadd.f32 %v1365_v47, %v1364_v45 }
 0xbab   :  { %v1368_v50 = vmul.f32 0.5, %v1366_v48 }
 0xbad   :  { %v1369_v51 = vsub.f32 %v1359_v40, %v1368_v50 }
 0xbaf   :  { %v1370_v52 = vmul.f32 %v1369_v51, %v1369_v51 }
 0xbb1   :  { %v1371_v53 = vsel %vm1050_vm10, %v1370_v52, 0.0 }
 0xbb2   :  { %v1372_v54 = vrot.slane %v1371_v53, 4 }
 0xbb4   :  { %v1373_v4 = vadd.f32 %v1372_v54, %v1371_v53 }
 0xbb6   :  { %v1374_v55 = vrot.slane %v1373_v4, 2 }
 0xbb8   :  { %v1375_v9 = vadd.f32 %v1374_v55, %v1373_v4 }
 0xbba   :  { %v1376_v56 = vrot.slane %v1375_v9, 1 }
 0xbbc   :  { %v1377_v57 = vadd.f32 %v1376_v56, %v1375_v9 }
 0xbbe   :  { %v1378_v58 = vmul.f32 0.5, %v1377_v57 }
 0xbc0   :  { %v1379_v59 = vadd.f32 1e-05, %v1378_v58 }
 0xbc2   :  { %1711 = vrsqrt.f32 %v1379_v59 }
 0xbcc   :  { %v1712_v60 = vpop.eup %1711 }
 0xbcd   :  { %v1381_v2 = vmul.f32 %v1712_v60, %v1369_v51 }
 0xbcf   :  { %v1389_v5 = vmul.f32 %v1522_v63, %v1381_v2 }
 0xbd1   :  { %v1397_v6 = vadd.f32 %v1523_v3, %v1389_v5 }
 0xbd3   :  { %v1398_v7 = vpack.c.bf16 %v1397_v6, %v1397_v6 }
 0xbd5   :  { %1630 = vmatmul.mubr.msk.bf16.vlgmr.msra.gmra.mrb[20].mxu0 %vm139_vm0, %v1398_v7 }
 0xbd6   :  { %1768 = shalt.err (!%p1765_p10)
}
 0xbd7   :  { %s1769_s2 = scalar_lea.hbm %s2325_s20, 32 }
 0xbd8   :  { %p1770_p11 = scmp.ne.s32.totalorder %s2325_s20, %s1769_s2  ;;  %p1773_p12 = scmp.lt.u32.totalorder %s1769_s2, %s2325_s20 }
 0xbda   :  { %p1775_p13 = pnand %p1773_p12, %p1770_p11 }
 0xbdc   :  { %1778 = shalt.err (!%p1775_p13)
}
 0xbdd   :  { %1468 = dma.vmem_to_hbm [thread:$0]  %s1466_s11, 32, %s2325_s20, [#allocation5]  }
 0xbde   :  { %s1824_s29 = smov [#allocation9]  }
 0xbdf   :  { %s1475_s14 = sshll.u32 %s1824_s29, 4  ;;  %s1476_s14 = int_to_ptr.vmem [resolvable:$true] %s1475_s14 }
 0xbe0   :  { %s1779_s7 = scalar_lea.vmem %s1476_s14, 32  ;;  %p1784_p1 = scmp.lt.s32.totalorder %s1476_s14, %s1476_s14 }
 0xbe1   :  { %p1780_p0 = scmp.ne.s32.totalorder %s1476_s14, %s1779_s7  ;;  %p1785_p2 = scmp.lt.s32.totalorder %s1779_s7, %s1779_s7 }
 0xbe3   :  { %p1786_p3 = por %p1785_p2, %p1784_p1 }
 0xbe5   :  { %p1787_p4 = pnand %p1786_p3, %p1780_p0 }
 0xca8   :  { %v1452_v8 = vpop.f32.mrb[20].mxu0 }
 0xca9   :  { %1458 = vst [vmem:[#allocation9] sm:$0x3] %v1452_v8  ;;  %v1631_v44 = vpop.f32.mrb[21].mxu0 }
 0xcaa   :  { %v1455_v12 = vpop.f32.mrb[22].mxu0 }
 0xcab   :  { %1790 = shalt.err (!%p1787_p4)
}
 0xcac   :  { %s1791_s13 = scalar_lea.hbm %s2326_s21, 32 }
 0xcad   :  { %p1792_p5 = scmp.ne.s32.totalorder %s2326_s21, %s1791_s13  ;;  %p1795_p6 = scmp.lt.u32.totalorder %s1791_s13, %s2326_s21 }
 0xcaf   :  { %p1797_p7 = pnand %p1795_p6, %p1792_p5 }
 0xcb1   :  { %1800 = shalt.err (!%p1797_p7)
}
 0xcb2   :  { %1478 = dma.vmem_to_hbm [thread:$0]  %s1476_s14, 32, %s2326_s21, [#allocation10]   ;;  %v1632_v13 = vpop.f32.mrb[23].mxu0 }
 0xcb3   :  { %1805 = dma.done.wait [#allocation5], 32  }
 0xcb4   :  { %1806 = vsyncadd [#allocation5], 4294967264 }
 0xcb5   :  { %1807 = dma.done.wait [#allocation10], 32  }
 0xcb6   :  { %1808 = vsyncadd [#allocation10], 4294967264 }
 0xcb7   :  { %1485 = vsyncpa [#allocation4], 1 }
 0xcb8   :  { %1486 = vsyncpa [#allocation7], 1 }
 0xcb9   :  { %1487 = vsyncpa [#allocation5], 1 }
 0xcba   :  { %1488 = vsyncpa [#allocation10], 1 }

</bundles_post_ra>
